<compile_context>
chip_gen: v7x
topology: tpu7x:2x2x1
jax: 0.10.0
libtpu: 0.0.40
codegen_flags: <defaults>
</compile_context>

<pallas_src>
import functools

import jax
import jax.numpy as jnp
from jax import lax
from jax.experimental import pallas as pl
from jax.experimental.pallas import tpu as pltpu

F32 = jnp.float32


# ----------------------------------------------------------------------------
# fused kernel body (batch_block batch elements per grid step, channel-major)
# ----------------------------------------------------------------------------
def _eca_kernel(x_ref, y_ref, wq_ref, bq_ref, wkv_ref, bkv_ref,
                wr_ref, br_ref, blk_ref, out_ref,
                *, key_channels, value_channels, head_count, batch_block):
    K, V, H = key_channels, value_channels, head_count
    hk = K // H

    wq = wq_ref[...]      # (K, Cx)
    bq = bq_ref[...]      # (K, 1)
    wkv = wkv_ref[...]    # (K+V, Cy)   rows [0:K)=Wk^T, [K:K+V)=Wv^T
    bkv = bkv_ref[...]    # (K+V, 1)
    wr = wr_ref[...]      # (Cx, V)
    br = br_ref[...]      # (Cx, 1)
    blk = blk_ref[...]    # (V, K) block-diagonal head-membership mask (const)

    # Static batch loop: fully unrolled at trace time (equivalent to
    # lax.fori_loop(..., unroll=True) at these tiny trip counts); every
    # iteration ends with a direct out_ref store so live ranges stay short.
    for b in range(batch_block):
        x = x_ref[b]      # (Cx, HW)
        y = y_ref[b]      # (Cy, HW)

        # 1x1-conv projections in channel-major form: W^T @ X (+ bias col).
        q = jnp.dot(wq, x, preferred_element_type=jnp.float32) + bq    # (K, HW)
        kv = jnp.dot(wkv, y, preferred_element_type=jnp.float32) + bkv  # (K+V, HW)
        k = kv[:K]        # sublane-aligned split
        v = kv[K:]

        # keys: softmax over the spatial (lane) axis, per channel.  Column
        # separable, so no per-head slicing needed; full 256-lane vregs.
        ke = jnp.exp(k - jnp.max(k, axis=1, keepdims=True))
        k_sm = ke / jnp.sum(ke, axis=1, keepdims=True)

        # queries: per-head softmax over head channels (16-sublane groups),
        # via static sublane slices (no where(-inf) masking).
        q_heads = []
        for h in range(H):
            qh = q[h * hk:(h + 1) * hk, :]
            qe = jnp.exp(qh - jnp.max(qh, axis=0, keepdims=True))
            q_heads.append(qe / jnp.sum(qe, axis=0, keepdims=True))
        q_sm = jnp.concatenate(q_heads, axis=0)                          # (K, HW)

        # Per-head contexts as ONE (V, K) matmul masked block-diagonal.
        # (Single contraction over HW with both operands lane-major.)
        ctx_t = lax.dot_general(v, k_sm, (((1,), (1,)), ((), ())),
                                preferred_element_type=jnp.float32)     # (V, K)

        # Reassociated tail: fold contexts into the reprojection weight first
        # (tiny (Cx,V)@(V,K)), then ONE lane-dense (Cx,K)@(K,HW) matmul.
        wr_eff = jnp.dot(wr, ctx_t * blk, preferred_element_type=jnp.float32)
        out_ref[b] = jnp.dot(wr_eff, q_sm,
                             preferred_element_type=jnp.float32) + br   # (Cx, HW)


# ----------------------------------------------------------------------------
# one-time parameter fusion (hoisted out of the per-call path)
# ----------------------------------------------------------------------------
def fuse_eca_params(params, *, key_channels, value_channels, head_count):
    K, V, H = key_channels, value_channels, head_count
    hk, hv = K // H, V // H
    wq_t = jnp.asarray(params["wq"].T, F32)                         # (K, Cx)
    wkv_t = jnp.concatenate([params["wk"].T, params["wv"].T], 0)     # (K+V, Cy)
    bq_c = jnp.asarray(params["bq"].reshape(K, 1), F32)
    bkv_c = jnp.concatenate([params["bk"].reshape(K, 1),
                             params["bv"].reshape(V, 1)], 0)
    wr_t = jnp.asarray(params["wr"].T, F32)                          # (Cx, V)
    br_c = jnp.asarray(params["br"].reshape(-1, 1), F32)             # (Cx, 1)
    blk_vk = (jnp.arange(V)[:, None] // hv ==
              jnp.arange(K)[None, :] // hk).astype(F32)              # (V, K)
    return dict(wq_t=wq_t, bq=bq_c, wkv_t=wkv_t, bkv=bkv_c,
                wr_t=wr_t, br=br_c, blk=blk_vk)


def _pick_batch_block(batch, target):
    # largest divisor of `batch` <= target, preferring >= 2 grid steps so both
    # v7x TensorCores stay busy.
    divs = [d for d in range(1, min(batch, target) + 1) if batch % d == 0]
    multi = [d for d in divs if batch // d >= 2]
    return max(multi) if multi else max(divs)


# ----------------------------------------------------------------------------
# wrapper: NO layout work per call — two free reshapes around the pallas_call
# ----------------------------------------------------------------------------
def efficient_cross_attention(x_nchw, y_nchw, fused, *, key_channels,
                              value_channels, head_count, batch_block=8):
    B, Cx, Hh, Ww = x_nchw.shape
    Cy = y_nchw.shape[1]
    HW = Hh * Ww
    K, V = key_channels, value_channels
    assert K % head_count == 0 and V % head_count == 0

    bblk = _pick_batch_block(B, batch_block)
    grid = B // bblk

    x_cm = x_nchw.reshape(B, Cx, HW)      # contiguous merge: free
    y_cm = y_nchw.reshape(B, Cy, HW)

    kernel = functools.partial(_eca_kernel, key_channels=K, value_channels=V,
                               head_count=head_count, batch_block=bblk)
    out_cm = pl.pallas_call(
        kernel,
        out_shape=jax.ShapeDtypeStruct((B, Cx, HW), F32),
        grid=(grid,),
        in_specs=[
            pl.BlockSpec((bblk, Cx, HW), lambda i: (i, 0, 0)),
            pl.BlockSpec((bblk, Cy, HW), lambda i: (i, 0, 0)),
            pl.BlockSpec((K, Cx), lambda i: (0, 0)),
            pl.BlockSpec((K, 1), lambda i: (0, 0)),
            pl.BlockSpec((K + V, Cy), lambda i: (0, 0)),
            pl.BlockSpec((K + V, 1), lambda i: (0, 0)),
            pl.BlockSpec((Cx, V), lambda i: (0, 0)),
            pl.BlockSpec((Cx, 1), lambda i: (0, 0)),
            pl.BlockSpec((V, K), lambda i: (0, 0)),
        ],
        out_specs=pl.BlockSpec((bblk, Cx, HW), lambda i: (i, 0, 0)),
        compiler_params=pltpu.CompilerParams(
            dimension_semantics=("parallel",)),
    )(x_cm, y_cm, fused["wq_t"], fused["bq"], fused["wkv_t"], fused["bkv"],
      fused["wr_t"], fused["br"], fused["blk"])

    return out_cm.reshape(B, Cx, Hh, Ww)   # contiguous split: free


# ----------------------------------------------------------------------------
# pure-JAX reference mirroring the torch per-head loop exactly
# ----------------------------------------------------------------------------
def eca_reference(x_nchw, y_nchw, p, *, key_channels, value_channels,
                  head_count):
    B, Cx, Hh, Ww = x_nchw.shape
    Cy = y_nchw.shape[1]
    HW = Hh * Ww
    hk, hv = key_channels // head_count, value_channels // head_count
    x_tok = x_nchw.transpose(0, 2, 3, 1).reshape(B, HW, Cx)
    y_tok = y_nchw.transpose(0, 2, 3, 1).reshape(B, HW, Cy)
    hp = lax.Precision.HIGHEST

    def one(x, y):
        k = jnp.dot(y, p["wk"], precision=hp) + p["bk"]
        q = jnp.dot(x, p["wq"], precision=hp) + p["bq"]
        v = jnp.dot(y, p["wv"], precision=hp) + p["bv"]
        outs = []
        for i in range(head_count):
            ks = jax.nn.softmax(k[:, i * hk:(i + 1) * hk], axis=0)
            qs = jax.nn.softmax(q[:, i * hk:(i + 1) * hk], axis=1)
            vs = v[:, i * hv:(i + 1) * hv]
            ctx = jnp.dot(ks.T, vs, precision=hp)                   # (hk, hv)
            outs.append(jnp.dot(qs, ctx, precision=hp))             # (HW, hv)
        agg = jnp.concatenate(outs, axis=1)
        return jnp.dot(agg, p["wr"], precision=hp) + p["br"]

    out_tok = jax.vmap(one)(x_tok, y_tok)
    return out_tok.reshape(B, Hh, Ww, Cx).transpose(0, 3, 1, 2)


# ----------------------------------------------------------------------------
# deterministic synthetic parameters (1x1 convs stored as (Cin, Cout) mats)
# ----------------------------------------------------------------------------
def init_params(key, in_channels_x, in_channels_y, key_channels,
                value_channels):
    ks = iter(jax.random.split(key, 8))

    def nrm(shape, scale=0.1):
        return scale * jax.random.normal(next(ks), shape, F32)

    return {
        "wk": nrm((in_channels_y, key_channels)),
        "bk": nrm((1, key_channels), 0.02),
        "wq": nrm((in_channels_x, key_channels)),
        "bq": nrm((1, key_channels), 0.02),
        "wv": nrm((in_channels_y, value_channels)),
        "bv": nrm((1, value_channels), 0.02),
        "wr": nrm((value_channels, in_channels_x)),
        "br": nrm((1, in_channels_x), 0.02),
    }


if __name__ == "__main__":
    B, Hh, Ww = 2, 16, 16
    Cx, Cy = 64, 64          # in_channels_x / in_channels_y
    K, V, heads = 64, 64, 4  # key_channels / value_channels / head_count

    key = jax.random.PRNGKey(0)
    kp, kx, ky = jax.random.split(key, 3)
    params = init_params(kp, Cx, Cy, K, V)
    x = jax.random.normal(kx, (B, Cx, Hh, Ww), F32)
    y = jax.random.normal(ky, (B, Cy, Hh, Ww), F32)

    # weight fusion / mask construction happens ONCE, outside the call path
    fused = fuse_eca_params(params, key_channels=K, value_channels=V,
                            head_count=heads)

    fwd = jax.jit(lambda a, b: efficient_cross_attention(
        a, b, fused, key_channels=K, value_channels=V, head_count=heads))
    out = fwd(x, y)
    jax.block_until_ready(out)
    assert out.shape == (B, Cx, Hh, Ww)

    ref = eca_reference(x, y, params, key_channels=K, value_channels=V,
                        head_count=heads)
    assert bool(jnp.all(jnp.isfinite(out)))
    err = float(jnp.max(jnp.abs(out - ref)))
    # Note: kernel matmuls run at default MXU precision (bf16 multiplies,
    # f32 accumulation); reference uses Precision.HIGHEST.
    assert bool(jnp.allclose(out, ref, atol=2e-2, rtol=2e-2)), err

    print("KERNEL_OK")
</pallas_src>

<mosaic_0001>
module attributes {stable_mosaic.version = 11 : i64} {
  func.func @_eca_kernel(%arg0: i32, %arg1: memref<1x64x256xf32, #tpu.memory_space<vmem>>, %arg2: memref<1x64x256xf32, #tpu.memory_space<vmem>>, %arg3: memref<64x64xf32, #tpu.memory_space<vmem>>, %arg4: memref<64x1xf32, #tpu.memory_space<vmem>>, %arg5: memref<128x64xf32, #tpu.memory_space<vmem>>, %arg6: memref<128x1xf32, #tpu.memory_space<vmem>>, %arg7: memref<64x64xf32, #tpu.memory_space<vmem>>, %arg8: memref<64x1xf32, #tpu.memory_space<vmem>>, %arg9: memref<64x64xf32, #tpu.memory_space<vmem>>, %arg10: memref<1x64x256xf32, #tpu.memory_space<vmem>>) attributes {dimension_semantics = [#tpu.dimension_semantics<parallel>], iteration_bounds = array<i64: 2>, scalar_prefetch = 0 : i64, scratch_operands = 0 : i64, tpu.core_type = #tpu.core_type<tc>, window_params = [{transform_indices = @transform_0, window_bounds = array<i64: 1, 64, 256>}, {transform_indices = @transform_1, window_bounds = array<i64: 1, 64, 256>}, {pipeline_mode = #tpu.pipeline_mode<synchronous>, transform_indices = @transform_2, window_bounds = array<i64: 64, 64>}, {pipeline_mode = #tpu.pipeline_mode<synchronous>, transform_indices = @transform_3, window_bounds = array<i64: 64, 1>}, {pipeline_mode = #tpu.pipeline_mode<synchronous>, transform_indices = @transform_4, window_bounds = array<i64: 128, 64>}, {pipeline_mode = #tpu.pipeline_mode<synchronous>, transform_indices = @transform_5, window_bounds = array<i64: 128, 1>}, {pipeline_mode = #tpu.pipeline_mode<synchronous>, transform_indices = @transform_6, window_bounds = array<i64: 64, 64>}, {pipeline_mode = #tpu.pipeline_mode<synchronous>, transform_indices = @transform_7, window_bounds = array<i64: 64, 1>}, {pipeline_mode = #tpu.pipeline_mode<synchronous>, transform_indices = @transform_8, window_bounds = array<i64: 64, 64>}, {transform_indices = @transform_9, window_bounds = array<i64: 1, 64, 256>}]} {
    %c0 = arith.constant 0 : index
    %c0_0 = arith.constant 0 : index
    %0 = vector.load %arg3[%c0, %c0_0] : memref<64x64xf32, #tpu.memory_space<vmem>>, vector<64x64xf32>
    %c0_1 = arith.constant 0 : index
    %c0_2 = arith.constant 0 : index
    %1 = vector.load %arg4[%c0_1, %c0_2] : memref<64x1xf32, #tpu.memory_space<vmem>>, vector<64x1xf32>
    %c0_3 = arith.constant 0 : index
    %c0_4 = arith.constant 0 : index
    %2 = vector.load %arg5[%c0_3, %c0_4] : memref<128x64xf32, #tpu.memory_space<vmem>>, vector<128x64xf32>
    %c0_5 = arith.constant 0 : index
    %c0_6 = arith.constant 0 : index
    %3 = vector.load %arg6[%c0_5, %c0_6] : memref<128x1xf32, #tpu.memory_space<vmem>>, vector<128x1xf32>
    %c0_7 = arith.constant 0 : index
    %c0_8 = arith.constant 0 : index
    %4 = vector.load %arg7[%c0_7, %c0_8] : memref<64x64xf32, #tpu.memory_space<vmem>>, vector<64x64xf32>
    %c0_9 = arith.constant 0 : index
    %c0_10 = arith.constant 0 : index
    %5 = vector.load %arg8[%c0_9, %c0_10] : memref<64x1xf32, #tpu.memory_space<vmem>>, vector<64x1xf32>
    %c0_11 = arith.constant 0 : index
    %c0_12 = arith.constant 0 : index
    %6 = vector.load %arg9[%c0_11, %c0_12] : memref<64x64xf32, #tpu.memory_space<vmem>>, vector<64x64xf32>
    %c0_13 = arith.constant 0 : index
    %c0_14 = arith.constant 0 : index
    %c0_15 = arith.constant 0 : index
    %7 = vector.load %arg1[%c0_13, %c0_14, %c0_15] : memref<1x64x256xf32, #tpu.memory_space<vmem>>, vector<1x64x256xf32>
    %8 = vector.shape_cast %7 : vector<1x64x256xf32> to vector<64x256xf32>
    %c0_16 = arith.constant 0 : index
    %c0_17 = arith.constant 0 : index
    %c0_18 = arith.constant 0 : index
    %9 = vector.load %arg2[%c0_16, %c0_17, %c0_18] : memref<1x64x256xf32, #tpu.memory_space<vmem>>, vector<1x64x256xf32>
    %10 = vector.shape_cast %9 : vector<1x64x256xf32> to vector<64x256xf32>
    %cst = arith.constant dense<0.000000e+00> : vector<64x256xf32>
    %11 = tpu.matmul %0, %8, %cst {dimension_numbers = #tpu.dot_dimension_numbers<[1], [0], [0], [1], [0, 0, 1, 1], [], []>} : vector<64x64xf32>, vector<64x256xf32>, vector<64x256xf32> -> vector<64x256xf32>
    %12 = vector.broadcast %1 : vector<64x1xf32> to vector<64x256xf32>
    %13 = arith.addf %11, %12 : vector<64x256xf32>
    %cst_19 = arith.constant dense<0.000000e+00> : vector<128x256xf32>
    %14 = tpu.matmul %2, %10, %cst_19 {dimension_numbers = #tpu.dot_dimension_numbers<[1], [0], [0], [1], [0, 0, 1, 1], [], []>} : vector<128x64xf32>, vector<64x256xf32>, vector<128x256xf32> -> vector<128x256xf32>
    %15 = vector.broadcast %3 : vector<128x1xf32> to vector<128x256xf32>
    %16 = arith.addf %14, %15 : vector<128x256xf32>
    %17 = vector.extract_strided_slice %16 {offsets = [0, 0], sizes = [64, 256], strides = [1, 1]} : vector<128x256xf32> to vector<64x256xf32>
    %18 = vector.extract_strided_slice %16 {offsets = [64, 0], sizes = [64, 256], strides = [1, 1]} : vector<128x256xf32> to vector<64x256xf32>
    %cst_20 = arith.constant dense<0xFF800000> : vector<64xf32>
    %19 = vector.multi_reduction <maximumf>, %17, %cst_20 [1] : vector<64x256xf32> to vector<64xf32>
    %20 = vector.shape_cast %19 : vector<64xf32> to vector<64x1xf32>
    %21 = vector.broadcast %20 : vector<64x1xf32> to vector<64x256xf32>
    %22 = arith.subf %17, %21 : vector<64x256xf32>
    %23 = math.exp %22 : vector<64x256xf32>
    %cst_21 = arith.constant dense<0.000000e+00> : vector<64xf32>
    %24 = vector.multi_reduction <add>, %23, %cst_21 [1] : vector<64x256xf32> to vector<64xf32>
    %25 = vector.shape_cast %24 : vector<64xf32> to vector<64x1xf32>
    %26 = vector.broadcast %25 : vector<64x1xf32> to vector<64x256xf32>
    %27 = arith.divf %23, %26 : vector<64x256xf32>
    %28 = vector.extract_strided_slice %13 {offsets = [0, 0], sizes = [16, 256], strides = [1, 1]} : vector<64x256xf32> to vector<16x256xf32>
    %cst_22 = arith.constant dense<0xFF800000> : vector<256xf32>
    %29 = vector.multi_reduction <maximumf>, %28, %cst_22 [0] : vector<16x256xf32> to vector<256xf32>
    %30 = vector.shape_cast %29 : vector<256xf32> to vector<1x256xf32>
    %31 = vector.broadcast %30 : vector<1x256xf32> to vector<16x256xf32>
    %32 = arith.subf %28, %31 : vector<16x256xf32>
    %33 = math.exp %32 : vector<16x256xf32>
    %cst_23 = arith.constant dense<0.000000e+00> : vector<256xf32>
    %34 = vector.multi_reduction <add>, %33, %cst_23 [0] : vector<16x256xf32> to vector<256xf32>
    %35 = vector.shape_cast %34 : vector<256xf32> to vector<1x256xf32>
    %36 = vector.broadcast %35 : vector<1x256xf32> to vector<16x256xf32>
    %37 = arith.divf %33, %36 : vector<16x256xf32>
    %38 = vector.extract_strided_slice %13 {offsets = [16, 0], sizes = [16, 256], strides = [1, 1]} : vector<64x256xf32> to vector<16x256xf32>
    %cst_24 = arith.constant dense<0xFF800000> : vector<256xf32>
    %39 = vector.multi_reduction <maximumf>, %38, %cst_24 [0] : vector<16x256xf32> to vector<256xf32>
    %40 = vector.shape_cast %39 : vector<256xf32> to vector<1x256xf32>
    %41 = vector.broadcast %40 : vector<1x256xf32> to vector<16x256xf32>
    %42 = arith.subf %38, %41 : vector<16x256xf32>
    %43 = math.exp %42 : vector<16x256xf32>
    %cst_25 = arith.constant dense<0.000000e+00> : vector<256xf32>
    %44 = vector.multi_reduction <add>, %43, %cst_25 [0] : vector<16x256xf32> to vector<256xf32>
    %45 = vector.shape_cast %44 : vector<256xf32> to vector<1x256xf32>
    %46 = vector.broadcast %45 : vector<1x256xf32> to vector<16x256xf32>
    %47 = arith.divf %43, %46 : vector<16x256xf32>
    %48 = vector.extract_strided_slice %13 {offsets = [32, 0], sizes = [16, 256], strides = [1, 1]} : vector<64x256xf32> to vector<16x256xf32>
    %cst_26 = arith.constant dense<0xFF800000> : vector<256xf32>
    %49 = vector.multi_reduction <maximumf>, %48, %cst_26 [0] : vector<16x256xf32> to vector<256xf32>
    %50 = vector.shape_cast %49 : vector<256xf32> to vector<1x256xf32>
    %51 = vector.broadcast %50 : vector<1x256xf32> to vector<16x256xf32>
    %52 = arith.subf %48, %51 : vector<16x256xf32>
    %53 = math.exp %52 : vector<16x256xf32>
    %cst_27 = arith.constant dense<0.000000e+00> : vector<256xf32>
    %54 = vector.multi_reduction <add>, %53, %cst_27 [0] : vector<16x256xf32> to vector<256xf32>
    %55 = vector.shape_cast %54 : vector<256xf32> to vector<1x256xf32>
    %56 = vector.broadcast %55 : vector<1x256xf32> to vector<16x256xf32>
    %57 = arith.divf %53, %56 : vector<16x256xf32>
    %58 = vector.extract_strided_slice %13 {offsets = [48, 0], sizes = [16, 256], strides = [1, 1]} : vector<64x256xf32> to vector<16x256xf32>
    %cst_28 = arith.constant dense<0xFF800000> : vector<256xf32>
    %59 = vector.multi_reduction <maximumf>, %58, %cst_28 [0] : vector<16x256xf32> to vector<256xf32>
    %60 = vector.shape_cast %59 : vector<256xf32> to vector<1x256xf32>
    %61 = vector.broadcast %60 : vector<1x256xf32> to vector<16x256xf32>
    %62 = arith.subf %58, %61 : vector<16x256xf32>
    %63 = math.exp %62 : vector<16x256xf32>
    %cst_29 = arith.constant dense<0.000000e+00> : vector<256xf32>
    %64 = vector.multi_reduction <add>, %63, %cst_29 [0] : vector<16x256xf32> to vector<256xf32>
    %65 = vector.shape_cast %64 : vector<256xf32> to vector<1x256xf32>
    %66 = vector.broadcast %65 : vector<1x256xf32> to vector<16x256xf32>
    %67 = arith.divf %63, %66 : vector<16x256xf32>
    %68 = tpu.concatenate %37, %47, %57, %67 in 0 : vector<16x256xf32>, vector<16x256xf32>, vector<16x256xf32>, vector<16x256xf32> -> vector<64x256xf32>
    %cst_30 = arith.constant dense<0.000000e+00> : vector<64x64xf32>
    %69 = tpu.matmul %18, %27, %cst_30 {dimension_numbers = #tpu.dot_dimension_numbers<[1], [1], [0], [0], [0, 0, 1, 0], [], []>} : vector<64x256xf32>, vector<64x256xf32>, vector<64x64xf32> -> vector<64x64xf32>
    %70 = arith.mulf %69, %6 : vector<64x64xf32>
    %cst_31 = arith.constant dense<0.000000e+00> : vector<64x64xf32>
    %71 = tpu.matmul %4, %70, %cst_31 {dimension_numbers = #tpu.dot_dimension_numbers<[1], [0], [0], [1], [0, 0, 1, 1], [], []>} : vector<64x64xf32>, vector<64x64xf32>, vector<64x64xf32> -> vector<64x64xf32>
    %cst_32 = arith.constant dense<0.000000e+00> : vector<64x256xf32>
    %72 = tpu.matmul %71, %68, %cst_32 {dimension_numbers = #tpu.dot_dimension_numbers<[1], [0], [0], [1], [0, 0, 1, 1], [], []>} : vector<64x64xf32>, vector<64x256xf32>, vector<64x256xf32> -> vector<64x256xf32>
    %73 = vector.broadcast %5 : vector<64x1xf32> to vector<64x256xf32>
    %74 = arith.addf %72, %73 : vector<64x256xf32>
    %c0_33 = arith.constant 0 : index
    %c0_34 = arith.constant 0 : index
    %c0_35 = arith.constant 0 : index
    %75 = vector.load %arg10[%c0_33, %c0_34, %c0_35] : memref<1x64x256xf32, #tpu.memory_space<vmem>>, vector<1x64x256xf32>
    %76 = vector.shape_cast %75 : vector<1x64x256xf32> to vector<64x256xf32>
    %77 = vector.shape_cast %74 : vector<64x256xf32> to vector<1x64x256xf32>
    tpu.vector_store %arg10[%c0_33, %c0_34, %c0_35], %77 {strides = array<i32>} : memref<1x64x256xf32, #tpu.memory_space<vmem>>, vector<1x64x256xf32>,
    return
  }
  func.func @transform_0(%arg0: i32) -> (i32, i32, i32) {
    %c0_i32 = arith.constant 0 : i32
    %c0_i32_0 = arith.constant 0 : i32
    %c0_i32_1 = arith.constant 0 : i32
    return %arg0, %c0_i32, %c0_i32_0 : i32, i32, i32
  }
  func.func @transform_1(%arg0: i32) -> (i32, i32, i32) {
    %c0_i32 = arith.constant 0 : i32
    %c0_i32_0 = arith.constant 0 : i32
    %c0_i32_1 = arith.constant 0 : i32
    return %arg0, %c0_i32, %c0_i32_0 : i32, i32, i32
  }
  func.func @transform_2(%arg0: i32) -> (i32, i32) {
    %c0_i32 = arith.constant 0 : i32
    %c0_i32_0 = arith.constant 0 : i32
    %c0_i32_1 = arith.constant 0 : i32
    return %c0_i32, %c0_i32_0 : i32, i32
  }
  func.func @transform_3(%arg0: i32) -> (i32, i32) {
    %c0_i32 = arith.constant 0 : i32
    %c0_i32_0 = arith.constant 0 : i32
    %c0_i32_1 = arith.constant 0 : i32
    return %c0_i32, %c0_i32_0 : i32, i32
  }
  func.func @transform_4(%arg0: i32) -> (i32, i32) {
    %c0_i32 = arith.constant 0 : i32
    %c0_i32_0 = arith.constant 0 : i32
    %c0_i32_1 = arith.constant 0 : i32
    return %c0_i32, %c0_i32_0 : i32, i32
  }
  func.func @transform_5(%arg0: i32) -> (i32, i32) {
    %c0_i32 = arith.constant 0 : i32
    %c0_i32_0 = arith.constant 0 : i32
    %c0_i32_1 = arith.constant 0 : i32
    return %c0_i32, %c0_i32_0 : i32, i32
  }
  func.func @transform_6(%arg0: i32) -> (i32, i32) {
    %c0_i32 = arith.constant 0 : i32
    %c0_i32_0 = arith.constant 0 : i32
    %c0_i32_1 = arith.constant 0 : i32
    return %c0_i32, %c0_i32_0 : i32, i32
  }
  func.func @transform_7(%arg0: i32) -> (i32, i32) {
    %c0_i32 = arith.constant 0 : i32
    %c0_i32_0 = arith.constant 0 : i32
    %c0_i32_1 = arith.constant 0 : i32
    return %c0_i32, %c0_i32_0 : i32, i32
  }
  func.func @transform_8(%arg0: i32) -> (i32, i32) {
    %c0_i32 = arith.constant 0 : i32
    %c0_i32_0 = arith.constant 0 : i32
    %c0_i32_1 = arith.constant 0 : i32
    return %c0_i32, %c0_i32_0 : i32, i32
  }
  func.func @transform_9(%arg0: i32) -> (i32, i32, i32) {
    %c0_i32 = arith.constant 0 : i32
    %c0_i32_0 = arith.constant 0 : i32
    %c0_i32_1 = arith.constant 0 : i32
    return %arg0, %c0_i32, %c0_i32_0 : i32, i32, i32
  }
}

</mosaic_0001>

<bundles_post_ra>
// kernel: _lambda_.1
= control target key start
LH: loop header
LB: loop body
LE: loop exit
PB: predicated region body
PF: predicated region fallthrough
CT: control target
= control target key end

     0   :  { %s2086_s30 = smov 0   ;;  %s2851_s0 = inlined_call_operand.vmem [shape: f32[2,64,256], index: 0, kind: input, shape index: {}]   ;;  %s2852_s1 = inlined_call_operand.vmem [shape: f32[2,64,256], index: 1, kind: input, shape index: {}]   ;;  %s2853_s2 = inlined_call_operand.vmem [shape: f32[64,64], index: 2, kind: input, shape index: {}]   ;;  %s2854_s3 = inlined_call_operand.vmem [shape: f32[64,1], index: 3, kind: input, shape index: {}]   ;;  %s2855_s4 = inlined_call_operand.vmem [shape: f32[128,64], index: 4, kind: input, shape index: {}]   ;;  %s2856_s5 = inlined_call_operand.vmem [shape: f32[128,1], index: 5, kind: input, shape index: {}]   ;;  %s2857_s6 = inlined_call_operand.vmem [shape: f32[64,64], index: 6, kind: input, shape index: {}]   ;;  %s2858_s7 = inlined_call_operand.vmem [shape: f32[64,1], index: 7, kind: input, shape index: {}]   ;;  %s2859_s8 = inlined_call_operand.vmem [shape: f32[64,64], index: 8, kind: input, shape index: {}]   ;;  %s2860_s9 = inlined_call_operand.vmem [shape: f32[2,64,256], index: 9, kind: output, shape index: {}]  }
   0x1 LB: > { %s1730_s10 = sadd.s32 4294967295, %s2032_s30   ;;  %p1734_p0 = scmp.ge.s32.totalorder %s2032_s30, 1  ;;  %s2032_s30 = sphi %s2086_s30, %s19_s30  }
   0x2   : > { %p297_p1 = scmp.lt.s32.totalorder %s2032_s30, 3 }
   0x4   : > { %p298_p2 = pnand %p1734_p0, %p297_p1 }
   0x5   : > { %p338_p3 = scmp.lt.s32.totalorder (!%p298_p2), %s1730_s10, 1  ;;  %v2034_v0 = vmov (!%p298_p2), 0.0   ;;  %v2035_v1 = vmov (!%p298_p2), 0   ;;  %v385_v2 = vld [vmem:[%s2856_s5] sm:$0xff] (!%p298_p2)  ;;  %v387_v3 = vld [vmem:[%s2856_s5 + $0x10] sm:$0xff] (!%p298_p2)  ;;  %v386_v4 = vld [vmem:[%s2856_s5 + $0x8] sm:$0xff] (!%p298_p2) }
   0x6   : > { %301 = sbr.rel (%p298_p2) target bundleno = 1347 (0x543), region = 56  ;;  %827 = vmatprep.mubr.f32.mxu1 (!%p298_p2), %v2034_v0  ;;  %586 = vmatprep.mubr.f32.mxu0 (!%p298_p2), %v2034_v0  ;;  %v388_v5 = vld [vmem:[%s2856_s5 + $0x18] sm:$0xff] (!%p298_p2)  ;;  %v389_v9 = vld [vmem:[%s2856_s5 + $0x20] sm:$0xff] (!%p298_p2)  ;;  %v390_v20 = vld [vmem:[%s2856_s5 + $0x28] sm:$0xff] (!%p298_p2)  ;;  %vm497_vm0 = vcmask (!%p298_p2), 523264  }
   0x7   : > { %1928 = vset.pattern.permute.xlu0 (!%p298_p2), %v2035_v1  ;;  %1929 = vset.pattern.permute.xlu1 (!%p298_p2), %v2035_v1  ;;  %v391_v27 = vld [vmem:[%s2856_s5 + $0x30] sm:$0xff] (!%p298_p2)  ;;  %v392_v28 = vld [vmem:[%s2856_s5 + $0x38] sm:$0xff] (!%p298_p2)  ;;  %v369_v34 = vld [vmem:[%s2855_s4] sm:$0xff] (!%p298_p2) }
   0x8   : > { %637 = vperm.xlu0 (!%p298_p2), %1928, %v385_v2   ;;  %647 = vperm.xlu1 (!%p298_p2), %1929, %v387_v3   ;;  %v370_v35 = vld [vmem:[%s2855_s4 + $0x8] sm:$0xff] (!%p298_p2)  ;;  %v371_v36 = vld [vmem:[%s2855_s4 + $0x10] sm:$0xff] (!%p298_p2)  ;;  %v372_v37 = vld [vmem:[%s2855_s4 + $0x18] sm:$0xff] (!%p298_p2) }
   0x9   : > { %v373_v38 = vld [vmem:[%s2855_s4 + $0x20] sm:$0xff] (!%p298_p2)  ;;  %v374_v39 = vld [vmem:[%s2855_s4 + $0x28] sm:$0xff] (!%p298_p2)  ;;  %v375_v40 = vld [vmem:[%s2855_s4 + $0x30] sm:$0xff] (!%p298_p2) }
   0xa   : > { %v376_v41 = vld [vmem:[%s2855_s4 + $0x38] sm:$0xff] (!%p298_p2)  ;;  %v377_v42 = vld [vmem:[%s2855_s4 + $0x40] sm:$0xff] (!%p298_p2)  ;;  %v378_v43 = vld [vmem:[%s2855_s4 + $0x48] sm:$0xff] (!%p298_p2) }
   0xb   : > { %v379_v59 = vld [vmem:[%s2855_s4 + $0x50] sm:$0xff] (!%p298_p2)  ;;  %v380_v3 = vld [vmem:[%s2855_s4 + $0x58] sm:$0xff] (!%p298_p2) }
   0xc   : > { %642 = vperm.xlu0 (!%p298_p2), %1928, %v386_v4   ;;  %652 = vperm.xlu1 (!%p298_p2), %1929, %v388_v5  }
   0xd   : > { %s2862_s10 = smov (!%p338_p3, %s1730_s10), 1 }
   0xe   : > { %s2102_s15 = sshll.u32 %s2862_s10, 7 }
   0xf   : > { %s2111_s20 = scalar_lea.vmem %s2852_s1, %s2102_s15  ;;  %s2188_s10 = scalar_lea.vmem %s2851_s0, %s2102_s15 }
  0x10   : > { %v442_v6 = vld [vmem:[%s2111_s20 + $0x8] sm:$0xff]  ;;  %v444_v7 = vld [vmem:[%s2111_s20 + $0x18] sm:$0xff]  ;;  %v441_v8 = vld [vmem:[%s2111_s20] sm:$0xff]  ;;  %657 = vperm.xlu0 %1928, %v389_v9   ;;  %662 = vperm.xlu1 %1929, %v390_v20   ;;  %s2830_s11 = scalar_lea.vmem %s2860_s9, %s2102_s15 }
  0x11   : > { %v1846_v10 = vpack.c.bf16 %v444_v7, %v442_v6  ;;  %v443_v11 = vld [vmem:[%s2111_s20 + $0x10] sm:$0xff]  ;;  %v446_v12 = vld [vmem:[%s2111_s20 + $0x28] sm:$0xff]  ;;  %v448_v13 = vld [vmem:[%s2111_s20 + $0x38] sm:$0xff] }
  0x12   : > { %v1848_v14 = vpack.c.bf16 %v443_v11, %v441_v8  ;;  %v1850_v15 = vpack.c.bf16 %v448_v13, %v446_v12  ;;  %v445_v16 = vld [vmem:[%s2111_s20 + $0x20] sm:$0xff]  ;;  %v447_v17 = vld [vmem:[%s2111_s20 + $0x30] sm:$0xff]  ;;  %v450_v18 = vld [vmem:[%s2111_s20 + $0x48] sm:$0xff] }
  0x13   : > { %1847 = vmatprep.subr.bf16.mxu1 %v1846_v10  ;;  %v452_v19 = vld [vmem:[%s2111_s20 + $0x58] sm:$0xff]  ;;  %v1852_v21 = vpack.c.bf16 %v447_v17, %v445_v16  ;;  %v449_v23 = vld [vmem:[%s2111_s20 + $0x40] sm:$0xff]  ;;  %v451_v24 = vld [vmem:[%s2111_s20 + $0x50] sm:$0xff] }
  0x14   : > { %1849 = vmatpush1.bf16.msra.mxu1 %v1848_v14  ;;  %v1854_v22 = vpack.c.bf16 %v452_v19, %v450_v18  ;;  %v454_v25 = vld [vmem:[%s2111_s20 + $0x68] sm:$0xff]  ;;  %v456_v26 = vld [vmem:[%s2111_s20 + $0x78] sm:$0xff]  ;;  %v1856_v29 = vpack.c.bf16 %v451_v24, %v449_v23  ;;  %v453_v31 = vld [vmem:[%s2111_s20 + $0x60] sm:$0xff]  ;;  %667 = vperm.xlu0 %1928, %v391_v27  }
  0x15   : > { %1851 = vmatprep.subr.bf16.mxu1 %v1850_v15  ;;  %v1858_v30 = vpack.c.bf16 %v456_v26, %v454_v25  ;;  %v455_v32 = vld [vmem:[%s2111_s20 + $0x70] sm:$0xff]  ;;  %672 = vperm.xlu1 %1929, %v392_v28   ;;  %v426_v44 = vld [vmem:[%s2188_s10 + $0x8] sm:$0xff]  ;;  %v428_v45 = vld [vmem:[%s2188_s10 + $0x18] sm:$0xff] }
  0x16   : > { %v1860_v33 = vpack.c.bf16 %v455_v32, %v453_v31  ;;  %v425_v46 = vld [vmem:[%s2188_s10] sm:$0xff]  ;;  %v1830_v47 = vpack.c.bf16 %v428_v45, %v426_v44  ;;  %v427_v48 = vld [vmem:[%s2188_s10 + $0x10] sm:$0xff]  ;;  %v430_v49 = vld [vmem:[%s2188_s10 + $0x28] sm:$0xff] }
  0x17   : > { %v432_v50 = vld [vmem:[%s2188_s10 + $0x38] sm:$0xff]  ;;  %v1832_v51 = vpack.c.bf16 %v427_v48, %v425_v46  ;;  %v429_v53 = vld [vmem:[%s2188_s10 + $0x20] sm:$0xff]  ;;  %v431_v54 = vld [vmem:[%s2188_s10 + $0x30] sm:$0xff] }
  0x18   : > { %1853 = vmatpush1.bf16.msra.mxu1 %v1852_v21  ;;  %v1834_v52 = vpack.c.bf16 %v432_v50, %v430_v49  ;;  %v434_v55 = vld [vmem:[%s2188_s10 + $0x48] sm:$0xff]  ;;  %1831 = vmatprep.subr.bf16.mxu0 %v1830_v47  ;;  %v436_v56 = vld [vmem:[%s2188_s10 + $0x58] sm:$0xff]  ;;  %v1836_v57 = vpack.c.bf16 %v431_v54, %v429_v53  ;;  %v433_v60 = vld [vmem:[%s2188_s10 + $0x40] sm:$0xff] }
  0x19   : > { %1855 = vmatprep.subr.bf16.mxu1 %v1854_v22  ;;  %1833 = vmatpush1.bf16.msra.mxu0 %v1832_v51  ;;  %v1838_v58 = vpack.c.bf16 %v436_v56, %v434_v55  ;;  %v435_v61 = vld [vmem:[%s2188_s10 + $0x50] sm:$0xff]  ;;  %v438_v62 = vld [vmem:[%s2188_s10 + $0x68] sm:$0xff]  ;;  %v440_v63 = vld [vmem:[%s2188_s10 + $0x78] sm:$0xff] }
  0x1a   : > { %1835 = vmatprep.subr.bf16.mxu0 %v1834_v52  ;;  %v1840_v1 = vpack.c.bf16 %v435_v61, %v433_v60  ;;  %v1842_v2 = vpack.c.bf16 %v440_v63, %v438_v62  ;;  %v437_v4 = vld [vmem:[%s2188_s10 + $0x60] sm:$0xff]  ;;  %v439_v5 = vld [vmem:[%s2188_s10 + $0x70] sm:$0xff]  ;;  %v382_v9 = vld [vmem:[%s2855_s4 + $0x68] sm:$0xff] }
  0x1b   : > { %v1844_v6 = vpack.c.bf16 %v439_v5, %v437_v4  ;;  %v381_v7 = vld [vmem:[%s2855_s4 + $0x60] sm:$0xff]  ;;  %v354_v10 = vld [vmem:[%s2853_s2 + $0x8] sm:$0xff]  ;;  %v383_v11 = vld [vmem:[%s2855_s4 + $0x70] sm:$0xff] }
  0x1c   : > { %1857 = vmatpush1.bf16.msra.mxu1 %v1856_v29  ;;  %v353_v8 = vld [vmem:[%s2853_s2] sm:$0xff]  ;;  %v355_v12 = vld [vmem:[%s2853_s2 + $0x10] sm:$0xff]  ;;  %v356_v13 = vld [vmem:[%s2853_s2 + $0x18] sm:$0xff] }
  0x1d   : > { %1859 = vmatprep.subr.bf16.mxu1 %v1858_v30  ;;  %1837 = vmatpush1.bf16.msra.mxu0 %v1836_v57  ;;  %v357_v14 = vld [vmem:[%s2853_s2 + $0x20] sm:$0xff]  ;;  %v358_v50 = vld [vmem:[%s2853_s2 + $0x28] sm:$0xff]  ;;  %v359_v57 = vld [vmem:[%s2853_s2 + $0x30] sm:$0xff] }
  0x1e   : > { %1839 = vmatprep.subr.bf16.mxu0 %v1838_v58 }
  0x20   : > { %1861 = vmatpush1.bf16.msra.mxu1 %v1860_v33 }
  0x21   : > { %1841 = vmatpush1.bf16.msra.mxu0 %v1840_v1 }
  0x22   : > { %1843 = vmatprep.subr.bf16.mxu0 %v1842_v2  ;;  %v384_v2 = vld [vmem:[%s2855_s4 + $0x78] sm:$0xff] }
  0x23   : > { %1749 = vmatmul.mubr.msk.f32.vlgmr.msra.gmra.mrb[0].mxu1 %vm497_vm0, %v369_v34 }
  0x24   : > { %833 = vmatprep.mubr.f32.mxu1 %v2034_v0 }
  0x25   : > { %1845 = vmatpush1.bf16.msra.mxu0 %v1844_v6 }
  0x27   : > { %1750 = vmatmul.mubr.msk.f32.gmra.mrb[2].mxu1 %vm497_vm0, %v370_v35 }
  0x28   : > { %839 = vmatprep.mubr.f32.mxu1 %v2034_v0  ;;  %1741 = vmatmul.mubr.msk.f32.vlgmr.msra.gmra.mrb[0].mxu0 %vm497_vm0, %v353_v8 }
  0x29   : > { %592 = vmatprep.mubr.f32.mxu0 %v2034_v0 }
  0x2b   : > { %1751 = vmatmul.mubr.msk.f32.gmra.mrb[4].mxu1 %vm497_vm0, %v371_v36 }
  0x2c   : > { %845 = vmatprep.mubr.f32.mxu1 %v2034_v0  ;;  %1742 = vmatmul.mubr.msk.f32.gmra.mrb[2].mxu0 %vm497_vm0, %v354_v10 }
  0x2d   : > { %598 = vmatprep.mubr.f32.mxu0 %v2034_v0 }
  0x2f   : > { %1752 = vmatmul.mubr.msk.f32.gmra.mrb[6].mxu1 %vm497_vm0, %v372_v37 }
  0x30   : > { %851 = vmatprep.mubr.f32.mxu1 %v2034_v0  ;;  %1743 = vmatmul.mubr.msk.f32.gmra.mrb[4].mxu0 %vm497_vm0, %v355_v12 }
  0x31   : > { %604 = vmatprep.mubr.f32.mxu0 %v2034_v0 }
  0x33   : > { %1753 = vmatmul.mubr.msk.f32.gmra.mrb[8].mxu1 %vm497_vm0, %v373_v38 }
  0x34   : > { %857 = vmatprep.mubr.f32.mxu1 %v2034_v0  ;;  %1744 = vmatmul.mubr.msk.f32.gmra.mrb[6].mxu0 %vm497_vm0, %v356_v13 }
  0x35   : > { %610 = vmatprep.mubr.f32.mxu0 %v2034_v0 }
  0x37   : > { %1754 = vmatmul.mubr.msk.f32.gmra.mrb[10].mxu1 %vm497_vm0, %v374_v39 }
  0x38   : > { %863 = vmatprep.mubr.f32.mxu1 %v2034_v0  ;;  %1745 = vmatmul.mubr.msk.f32.gmra.mrb[8].mxu0 %vm497_vm0, %v357_v14 }
  0x39   : > { %616 = vmatprep.mubr.f32.mxu0 %v2034_v0 }
  0x3b   : > { %1755 = vmatmul.mubr.msk.f32.gmra.mrb[12].mxu1 %vm497_vm0, %v375_v40 }
  0x3c   : > { %869 = vmatprep.mubr.f32.mxu1 %v2034_v0  ;;  %1746 = vmatmul.mubr.msk.f32.gmra.mrb[10].mxu0 %vm497_vm0, %v358_v50 }
  0x3d   : > { %622 = vmatprep.mubr.f32.mxu0 %v2034_v0 }
  0x3f   : > { %1756 = vmatmul.mubr.msk.f32.gmra.mrb[14].mxu1 %vm497_vm0, %v376_v41 }
  0x40   : > { %875 = vmatprep.mubr.f32.mxu1 %v2034_v0  ;;  %1747 = vmatmul.mubr.msk.f32.gmra.mrb[12].mxu0 %vm497_vm0, %v359_v57 }
  0x41   : > { %628 = vmatprep.mubr.f32.mxu0 %v2034_v0 }
  0x43   : > { %1757 = vmatmul.mubr.msk.f32.gmra.mrb[16].mxu1 %vm497_vm0, %v377_v42 }
  0x44   : > { %881 = vmatprep.mubr.f32.mxu1 %v2034_v0 }
  0x47   : > { %1758 = vmatmul.mubr.msk.f32.gmra.mrb[18].mxu1 %vm497_vm0, %v378_v43 }
  0x48   : > { %887 = vmatprep.mubr.f32.mxu1 %v2034_v0 }
  0x4b   : > { %1759 = vmatmul.mubr.msk.f32.gmra.mrb[20].mxu1 %vm497_vm0, %v379_v59 }
  0x4c   : > { %893 = vmatprep.mubr.f32.mxu1 %v2034_v0 }
  0x4f   : > { %1760 = vmatmul.mubr.msk.f32.gmra.mrb[22].mxu1 %vm497_vm0, %v380_v3  ;;  %v360_v3 = vld [vmem:[%s2853_s2 + $0x38] sm:$0xff] }
  0x50   : > { %899 = vmatprep.mubr.f32.mxu1 %v2034_v0  ;;  %1748 = vmatmul.mubr.msk.f32.gmra.mrb[14].mxu0 %vm497_vm0, %v360_v3 }
  0x53   : > { %1761 = vmatmul.mubr.msk.f32.gmra.mrb[24].mxu1 %vm497_vm0, %v381_v7 }
  0x54   : > { %905 = vmatprep.mubr.f32.mxu1 %v2034_v0 }
  0x57   : > { %1762 = vmatmul.mubr.msk.f32.gmra.mrb[26].mxu1 %vm497_vm0, %v382_v9 }
  0x58   : > { %911 = vmatprep.mubr.f32.mxu1 %v2034_v0 }
  0x5b   : > { %1763 = vmatmul.mubr.msk.f32.gmra.mrb[28].mxu1 %vm497_vm0, %v383_v11 }
  0x5c   : > { %917 = vmatprep.mubr.f32.mxu1 %v2034_v0 }
  0x5f   : > { %1764 = vmatmul.mubr.msk.f32.gmra.mrb[30].mxu1 %vm497_vm0, %v384_v2 }
  0x60   : > { %1610 = vmatprep.mubr.f32.mxu1 %v2034_v0 }
  0x87   : > { %v638_v15 = vpop.permute.xlu0 %637  ;;  %v648_v25 = vpop.permute.xlu1 %647 }
  0x8b   : > { %v643_v20 = vpop.permute.xlu0 %642  ;;  %v653_v32 = vpop.permute.xlu1 %652 }
  0x8f   : > { %v658_v38 = vpop.permute.xlu0 %657  ;;  %v663_v44 = vpop.permute.xlu1 %662 }
  0x93   : > { %v668_v51 = vpop.permute.xlu0 %667 }
  0x94   : > { %v673_v58 = vpop.permute.xlu1 %672 }
  0xf6   : > { %v829_v16 = vpop.f32.mrb[0].mxu1 }
  0xf7   : > { %v2266_v17 = vadd.f32 %v829_v16, %v638_v15  ;;  %v831_v18 = vpop.f32.mrb[1].mxu1 }
  0xf8   : > { %v2268_v19 = vadd.f32 %v831_v18, %v638_v15 }
  0xfa   : > { %v835_v21 = vpop.f32.mrb[2].mxu1  ;;  %v924_v22 = vmax.f32 %v2266_v17, %v2268_v19 }
  0xfb   : > { %v2272_v23 = vadd.f32 %v835_v21, %v643_v20  ;;  %v837_v24 = vpop.f32.mrb[3].mxu1 }
  0xfc   : > { %v2274_v26 = vadd.f32 %v837_v24, %v643_v20  ;;  %925 = vmax.xlane.f32.xlu0 %v924_v22 }
  0xfe   : > { %v841_v27 = vpop.f32.mrb[4].mxu1  ;;  %v927_v28 = vmax.f32 %v2272_v23, %v2274_v26 }
  0xff   : > { %v2278_v29 = vadd.f32 %v841_v27, %v648_v25  ;;  %v843_v30 = vpop.f32.mrb[5].mxu1 }
 0x100   : > { %v2280_v31 = vadd.f32 %v843_v30, %v648_v25  ;;  %928 = vmax.xlane.f32.xlu1 %v927_v28 }
 0x102   : > { %v847_v33 = vpop.f32.mrb[6].mxu1  ;;  %v930_v34 = vmax.f32 %v2278_v29, %v2280_v31 }
 0x103   : > { %v2284_v35 = vadd.f32 %v847_v33, %v653_v32  ;;  %v849_v36 = vpop.f32.mrb[7].mxu1 }
 0x104   : > { %v2286_v37 = vadd.f32 %v849_v36, %v653_v32  ;;  %931 = vmax.xlane.f32.xlu0 %v930_v34 }
 0x106   : > { %v853_v39 = vpop.f32.mrb[8].mxu1  ;;  %v933_v40 = vmax.f32 %v2284_v35, %v2286_v37 }
 0x107   : > { %v2290_v41 = vadd.f32 %v853_v39, %v658_v38  ;;  %v855_v42 = vpop.f32.mrb[9].mxu1 }
 0x108   : > { %v2292_v43 = vadd.f32 %v855_v42, %v658_v38  ;;  %934 = vmax.xlane.f32.xlu0 %v933_v40 }
 0x10a   : > { %v859_v45 = vpop.f32.mrb[10].mxu1  ;;  %v936_v46 = vmax.f32 %v2290_v41, %v2292_v43 }
 0x10b   : > { %v2296_v47 = vadd.f32 %v859_v45, %v663_v44  ;;  %v861_v48 = vpop.f32.mrb[11].mxu1 }
 0x10c   : > { %v2298_v49 = vadd.f32 %v861_v48, %v663_v44  ;;  %937 = vmax.xlane.f32.xlu1 %v936_v46 }
 0x10e   : > { %v865_v52 = vpop.f32.mrb[12].mxu1  ;;  %v939_v53 = vmax.f32 %v2296_v47, %v2298_v49 }
 0x10f   : > { %v2307_v54 = vadd.f32 %v865_v52, %v668_v51  ;;  %v867_v55 = vpop.f32.mrb[13].mxu1 }
 0x110   : > { %v2309_v56 = vadd.f32 %v867_v55, %v668_v51  ;;  %940 = vmax.xlane.f32.xlu0 %v939_v53 }
 0x112   : > { %v871_v59 = vpop.f32.mrb[14].mxu1  ;;  %v942_v60 = vmax.f32 %v2307_v54, %v2309_v56 }
 0x113   : > { %v2318_v61 = vadd.f32 %v871_v59, %v673_v58  ;;  %v873_v62 = vpop.f32.mrb[15].mxu1 }
 0x114   : > { %v2320_v63 = vadd.f32 %v873_v62, %v673_v58  ;;  %943 = vmax.xlane.f32.xlu1 %v942_v60  ;;  %v393_v62 = vld [vmem:[%s2856_s5 + $0x40] sm:$0xff] }
 0x116   : > { %v945_v1 = vmax.f32 %v2318_v61, %v2320_v63 }
 0x118   : > { %946 = vmax.xlane.f32.xlu0 %v945_v1 }
 0x189   : > { %v926_v4 = vpop.xlane.xlu0 %925 }
 0x18a   : > { %v948_v5 = vsub.f32 %v2266_v17, %v926_v4  ;;  %v949_v6 = vsub.f32 %v2268_v19, %v926_v4 }
 0x18c   : > { %v964_v7 = vmul.f32 1.442695, %v948_v5  ;;  %v966_v8 = vmul.f32 1.442695, %v949_v6 }
 0x18d   : > { %v929_v9 = vpop.xlane.xlu1 %928 }
 0x18e   : > { %1930 = vpow2.f32 %v964_v7  ;;  %v950_v10 = vsub.f32 %v2272_v23, %v929_v9  ;;  %v951_v11 = vsub.f32 %v2274_v26, %v929_v9  ;;  %v394_v9 = vld [vmem:[%s2856_s5 + $0x48] sm:$0xff] }
 0x18f   : > { %1932 = vpow2.f32 %v966_v8 }
 0x190   : > { %v968_v12 = vmul.f32 1.442695, %v950_v10  ;;  %v970_v13 = vmul.f32 1.442695, %v951_v11 }
 0x191   : > { %v932_v14 = vpop.xlane.xlu0 %931 }
 0x192   : > { %1934 = vpow2.f32 %v968_v12  ;;  %v952_v15 = vsub.f32 %v2278_v29, %v932_v14  ;;  %v953_v16 = vsub.f32 %v2280_v31, %v932_v14 }
 0x193   : > { %1936 = vpow2.f32 %v970_v13  ;;  %v397_v13 = vld [vmem:[%s2856_s5 + $0x60] sm:$0xff] }
 0x194   : > { %v972_v17 = vmul.f32 1.442695, %v952_v15  ;;  %v974_v18 = vmul.f32 1.442695, %v953_v16  ;;  %v399_v16 = vld [vmem:[%s2856_s5 + $0x70] sm:$0xff] }
 0x195   : > { %v935_v19 = vpop.xlane.xlu0 %934 }
 0x196   : > { %1938 = vpow2.f32 %v972_v17  ;;  %v954_v20 = vsub.f32 %v2284_v35, %v935_v19  ;;  %v955_v21 = vsub.f32 %v2286_v37, %v935_v19 }
 0x197   : > { %1940 = vpow2.f32 %v974_v18 }
 0x198   : > { %v2341_v22 = vpop.eup %1930  ;;  %v976_v23 = vmul.f32 1.442695, %v954_v20  ;;  %v978_v24 = vmul.f32 1.442695, %v955_v21  ;;  %v2431_v20 = vpop.f32.mrb[0].mxu0  ;;  %v361_v21 = vld [vmem:[%s2854_s3] sm:$0xff] }
 0x199   : > { %v2343_v25 = vpop.eup %1932  ;;  %v938_v26 = vpop.xlane.xlu1 %937 }
 0x19a   : > { %1942 = vpow2.f32 %v976_v23  ;;  %v956_v27 = vsub.f32 %v2290_v41, %v938_v26  ;;  %v957_v28 = vsub.f32 %v2292_v43, %v938_v26  ;;  %v996_v29 = vadd.f32 %v2343_v25, %v2341_v22  ;;  %v2436_v23 = vpop.f32.mrb[1].mxu0 }
 0x19b   : > { %1944 = vpow2.f32 %v978_v24  ;;  %v2438_v24 = vpop.f32.mrb[2].mxu0 }
 0x19c   : > { %v2349_v30 = vpop.eup %1934  ;;  %v980_v31 = vmul.f32 1.442695, %v956_v27  ;;  %v982_v32 = vmul.f32 1.442695, %v957_v28  ;;  %997 = vadd.xlane.f32.xlu1 %v996_v29  ;;  %v363_v27 = vld [vmem:[%s2854_s3 + $0x10] sm:$0xff]  ;;  %v2445_v28 = vpop.f32.mrb[3].mxu0 }
 0x19d   : > { %v2351_v33 = vpop.eup %1936  ;;  %v941_v34 = vpop.xlane.xlu0 %940 }
 0x19e   : > { %1946 = vpow2.f32 %v980_v31  ;;  %v958_v35 = vsub.f32 %v2296_v47, %v941_v34  ;;  %v959_v36 = vsub.f32 %v2298_v49, %v941_v34  ;;  %v999_v37 = vadd.f32 %v2351_v33, %v2349_v30  ;;  %v2449_v31 = vpop.f32.mrb[4].mxu0 }
 0x19f   : > { %1948 = vpow2.f32 %v982_v32  ;;  %v2451_v32 = vpop.f32.mrb[5].mxu0 }
 0x1a0   : > { %v2357_v38 = vpop.eup %1938  ;;  %v984_v39 = vmul.f32 1.442695, %v958_v35  ;;  %v986_v40 = vmul.f32 1.442695, %v959_v36  ;;  %1000 = vadd.xlane.f32.xlu0 %v999_v37  ;;  %v2453_v34 = vpop.f32.mrb[6].mxu0  ;;  %v365_v36 = vld [vmem:[%s2854_s3 + $0x20] sm:$0xff] }
 0x1a1   : > { %v2359_v41 = vpop.eup %1940  ;;  %v944_v2 = vpop.xlane.xlu1 %943 }
 0x1a2   : > { %1950 = vpow2.f32 %v984_v39  ;;  %v1002_v42 = vadd.f32 %v2359_v41, %v2357_v38  ;;  %v960_v6 = vsub.f32 %v2307_v54, %v944_v2  ;;  %v961_v8 = vsub.f32 %v2309_v56, %v944_v2  ;;  %v2460_v37 = vpop.f32.mrb[7].mxu0  ;;  %v398_v2 = vld [vmem:[%s2856_s5 + $0x68] sm:$0xff] }
 0x1a3   : > { %1952 = vpow2.f32 %v986_v40  ;;  %v2462_v39 = vpop.f32.mrb[8].mxu0 }
 0x1a4   : > { %v2363_v43 = vpop.eup %1942  ;;  %1003 = vadd.xlane.f32.xlu1 %v1002_v42  ;;  %v988_v10 = vmul.f32 1.442695, %v960_v6  ;;  %v990_v11 = vmul.f32 1.442695, %v961_v8  ;;  %v2464_v40 = vpop.f32.mrb[9].mxu0  ;;  %v400_v6 = vld [vmem:[%s2856_s5 + $0x78] sm:$0xff] }
 0x1a5   : > { %v2365_v44 = vpop.eup %1944  ;;  %v947_v45 = vpop.xlane.xlu0 %946 }
 0x1a6   : > { %v962_v46 = vsub.f32 %v2318_v61, %v947_v45  ;;  %v963_v47 = vsub.f32 %v2320_v63, %v947_v45  ;;  %v1005_v48 = vadd.f32 %v2365_v44, %v2363_v43  ;;  %v2392_v63 = vpop.f32.mrb[16].mxu1  ;;  %v2466_v42 = vpop.f32.mrb[10].mxu0  ;;  %v367_v45 = vld [vmem:[%s2854_s3 + $0x30] sm:$0xff] }
 0x1a7   : > { %v2394_v1 = vpop.f32.mrb[17].mxu1 }
 0x1a8   : > { %v2371_v49 = vpop.eup %1946  ;;  %v992_v50 = vmul.f32 1.442695, %v962_v46  ;;  %v994_v51 = vmul.f32 1.442695, %v963_v47  ;;  %1006 = vadd.xlane.f32.xlu0 %v1005_v48  ;;  %v2396_v3 = vpop.f32.mrb[18].mxu1 }
 0x1a9   : > { %v2373_v52 = vpop.eup %1948  ;;  %v2398_v4 = vpop.f32.mrb[19].mxu1 }
 0x1aa   : > { %1954 = vpow2.f32 %v992_v50  ;;  %v1008_v53 = vadd.f32 %v2373_v52, %v2371_v49  ;;  %v2400_v5 = vpop.f32.mrb[20].mxu1  ;;  %v2471_v46 = vpop.f32.mrb[11].mxu0  ;;  %v409_v50 = vld [vmem:[%s2858_s7] sm:$0xff] }
 0x1ab   : > { %1956 = vpow2.f32 %v994_v51  ;;  %v2403_v7 = vpop.f32.mrb[21].mxu1  ;;  %v2473_v47 = vpop.f32.mrb[12].mxu0  ;;  %v411_v51 = vld [vmem:[%s2858_s7 + $0x10] sm:$0xff] }
 0x1ac   : > { %v2377_v55 = vpop.eup %1950  ;;  %1009 = vadd.xlane.f32.xlu1 %v1008_v53  ;;  %v2409_v12 = vpop.f32.mrb[22].mxu1  ;;  %1958 = vpow2.f32 %v988_v10  ;;  %v395_v53 = vld [vmem:[%s2856_s5 + $0x50] sm:$0xff]  ;;  %v362_v10 = vld [vmem:[%s2854_s3 + $0x8] sm:$0xff] }
 0x1ad   : > { %v2379_v57 = vpop.eup %1952  ;;  %v2414_v14 = vpop.f32.mrb[23].mxu1  ;;  %1960 = vpow2.f32 %v990_v11  ;;  %v364_v11 = vld [vmem:[%s2854_s3 + $0x18] sm:$0xff] }
 0x1ae   : > { %v1011_v58 = vadd.f32 %v2379_v57, %v2377_v55  ;;  %v2416_v54 = vpop.f32.mrb[24].mxu1  ;;  %v2475_v48 = vpop.f32.mrb[13].mxu0 }
 0x1af   : > { %v2418_v15 = vpop.f32.mrb[25].mxu1 }
 0x1b0   : > { %1012 = vadd.xlane.f32.xlu0 %v1011_v58  ;;  %v2420_v56 = vpop.f32.mrb[26].mxu1  ;;  %v413_v58 = vld [vmem:[%s2858_s7 + $0x20] sm:$0xff] }
 0x1b1   : > { %v2425_v17 = vpop.f32.mrb[27].mxu1 }
 0x1b2   : > { %v2427_v18 = vpop.f32.mrb[28].mxu1 }
 0x1b3   : > { %v2429_v19 = vpop.f32.mrb[29].mxu1 }
 0x1b4   : > { %v2383_v59 = vpop.eup %1954  ;;  %v2501_v8 = vpop.f32.mrb[30].mxu1 }
 0x1b5   : > { %v2385_v60 = vpop.eup %1956 }
 0x1b6   : > { %v1017_v61 = vadd.f32 %v2385_v60, %v2383_v59  ;;  %v2440_v26 = vpop.eup %1958 }
 0x1b7   : > { %v2447_v29 = vpop.eup %1960 }
 0x1b8   : > { %1018 = vadd.xlane.f32.xlu0 %v1017_v61  ;;  %v1014_v35 = vadd.f32 %v2447_v29, %v2440_v26  ;;  %v396_v61 = vld [vmem:[%s2856_s5 + $0x58] sm:$0xff] }
 0x1bd   : > { %677 = vperm.xlu1 %1929, %v393_v62   ;;  %v415_v62 = vld [vmem:[%s2858_s7 + $0x30] sm:$0xff] }
 0x1ce   : > { %682 = vperm.xlu0 %1928, %v394_v9   ;;  %v2503_v9 = vpop.f32.mrb[31].mxu1 }
 0x1d2   : > { %697 = vperm.xlu0 %1928, %v397_v13   ;;  %v366_v13 = vld [vmem:[%s2854_s3 + $0x28] sm:$0xff] }
 0x1d6   : > { %707 = vperm.xlu0 %1928, %v399_v16   ;;  %v368_v16 = vld [vmem:[%s2854_s3 + $0x38] sm:$0xff] }
 0x1da   : > { %459 = vperm.xlu0 %1928, %v361_v21   ;;  %v410_v21 = vld [vmem:[%s2858_s7 + $0x8] sm:$0xff] }
 0x1de   : > { %469 = vperm.xlu0 %1928, %v363_v27   ;;  %v2520_v27 = vpop.f32.mrb[14].mxu0 }
 0x1e1   : > { %1015 = vadd.xlane.f32.xlu1 %v1014_v35  ;;  %v412_v35 = vld [vmem:[%s2858_s7 + $0x18] sm:$0xff] }
 0x1e2   : > { %479 = vperm.xlu0 %1928, %v365_v36   ;;  %v2525_v36 = vpop.f32.mrb[15].mxu0 }
 0x1e6   : > { %489 = vperm.xlu0 %1928, %v367_v45   ;;  %v414_v45 = vld [vmem:[%s2858_s7 + $0x28] sm:$0xff] }
 0x1ea   : > { %1472 = vperm.xlu0 %1928, %v409_v50   ;;  %v416_v50 = vld [vmem:[%s2858_s7 + $0x38] sm:$0xff] }
 0x1ee   : > { %1482 = vperm.xlu0 %1928, %v411_v51  }
 0x1f2   : > { %687 = vperm.xlu1 %1929, %v395_v53   ;;  %1492 = vperm.xlu0 %1928, %v413_v58  }
 0x1f6   : > { %692 = vperm.xlu1 %1929, %v396_v61   ;;  %1502 = vperm.xlu0 %1928, %v415_v62  }
 0x1fa   : > { %702 = vperm.xlu1 %1929, %v398_v2  }
 0x1fe   : > { %712 = vperm.xlu1 %1929, %v400_v6  }
 0x202   : > { %464 = vperm.xlu1 %1929, %v362_v10  }
 0x206   : > { %474 = vperm.xlu1 %1929, %v364_v11  }
 0x20a   : > { %484 = vperm.xlu1 %1929, %v366_v13  }
 0x20e   : > { %494 = vperm.xlu1 %1929, %v368_v16  }
 0x212   : > { %1477 = vperm.xlu1 %1929, %v410_v21  }
 0x216   : > { %1487 = vperm.xlu1 %1929, %v412_v35  }
 0x21a   : > { %1497 = vperm.xlu1 %1929, %v414_v45  }
 0x21e   : > { %1507 = vperm.xlu1 %1929, %v416_v50  }
 0x229   : > { %v998_v51 = vpop.xlane.xlu1 %997 }
 0x22a   : > { %1962 = vrcp.f32 %v998_v51 }
 0x22d   : > { %v1001_v53 = vpop.xlane.xlu0 %1000 }
 0x22e   : > { %1964 = vrcp.f32 %v1001_v53 }
 0x231   : > { %v1004_v58 = vpop.xlane.xlu1 %1003 }
 0x232   : > { %1966 = vrcp.f32 %v1004_v58 }
 0x234   : > { %v1963_v62 = vpop.eup %1962 }
 0x235   : > { %v1007_v61 = vpop.xlane.xlu0 %1006  ;;  %v1022_v10 = vmul.f32 %v1963_v62, %v2343_v25  ;;  %v1021_v13 = vmul.f32 %v1963_v62, %v2341_v22 }
 0x236   : > { %1968 = vrcp.f32 %v1007_v61 }
 0x238   : > { %v1965_v2 = vpop.eup %1964 }
 0x239   : > { %v1010_v6 = vpop.xlane.xlu1 %1009  ;;  %v1025_v11 = vmul.f32 %v1965_v2, %v2351_v33  ;;  %v1024_v16 = vmul.f32 %v1965_v2, %v2349_v30 }
 0x23a   : > { %1970 = vrcp.f32 %v1010_v6 }
 0x23b   : > { %v1862_v21 = vpack.c.bf16 %v1025_v11, %v1022_v10  ;;  %v1864_v35 = vpack.c.bf16 %v1024_v16, %v1021_v13 }
 0x23c   : > { %v1967_v51 = vpop.eup %1966 }
 0x23d   : > { %v678_v45 = vpop.permute.xlu1 %677  ;;  %v1013_v50 = vpop.xlane.xlu0 %1012  ;;  %1863 = vmatprep.subr.bf16.mxu0 %v1862_v21  ;;  %v1028_v33 = vmul.f32 %v1967_v51, %v2359_v41  ;;  %v1027_v30 = vmul.f32 %v1967_v51, %v2357_v38 }
 0x23e   : > { %v878_v53 = vadd.f32 %v2392_v63, %v678_v45  ;;  %v880_v58 = vadd.f32 %v2394_v1, %v678_v45  ;;  %1972 = vrcp.f32 %v1013_v50  ;;  %1865 = vmatpush1.bf16.xpose.msra.mxu0 %v1864_v35 }
 0x240   : > { %v1969_v25 = vpop.eup %1968  ;;  %1292 = vmatprep.mubr.f32.mxu0 %v880_v58 }
 0x241   : > { %v1031_v22 = vmul.f32 %v1969_v25, %v2365_v44  ;;  %v1030_v61 = vmul.f32 %v1969_v25, %v2363_v43 }
 0x243   : > { %v1866_v62 = vpack.c.bf16 %v1031_v22, %v1028_v33  ;;  %v1868_v2 = vpack.c.bf16 %v1030_v61, %v1027_v30 }
 0x244   : > { %v1971_v6 = vpop.eup %1970 }
 0x245   : > { %1867 = vmatprep.subr.bf16.mxu0 %v1866_v62  ;;  %v1034_v1 = vmul.f32 %v1971_v6, %v2373_v52  ;;  %v1033_v11 = vmul.f32 %v1971_v6, %v2371_v49  ;;  %v1019_v38 = vpop.xlane.xlu0 %1018 }
 0x246   : > { %1869 = vmatpush1.bf16.xpose.msra.mxu0 %v1868_v2  ;;  %1974 = vrcp.f32 %v1019_v38 }
 0x248   : > { %v1973_v63 = vpop.eup %1972 }
 0x249   : > { %v1037_v10 = vmul.f32 %v1973_v63, %v2379_v57  ;;  %v1036_v41 = vmul.f32 %v1973_v63, %v2377_v55 }
 0x24b   : > { %v1870_v13 = vpack.c.bf16 %v1037_v10, %v1034_v1  ;;  %v1872_v44 = vpack.c.bf16 %v1036_v41, %v1033_v11 }
 0x24d   : > { %1871 = vmatprep.subr.bf16.mxu0 %v1870_v13  ;;  %v683_v43 = vpop.permute.xlu0 %682 }
 0x24e   : > { %1873 = vmatpush1.bf16.xpose.msra.mxu0 %v1872_v44 }
 0x250   : > { %v1975_v57 = vpop.eup %1974 }
 0x251   : > { %v698_v16 = vpop.permute.xlu0 %697  ;;  %v1043_v58 = vmul.f32 %v1975_v57, %v2385_v60  ;;  %v1042_v33 = vmul.f32 %v1975_v57, %v2383_v59 }
 0x255   : > { %v2547_v35 = vpop.permute.xlu0 %707 }
 0x259   : > { %v460_v52 = vpop.permute.xlu0 %459 }
 0x25a   : > { %v2558_v63 = vadd.f32 %v2431_v20, %v460_v52  ;;  %v884_v20 = vadd.f32 %v2396_v3, %v683_v43  ;;  %v2588_v3 = vadd.f32 %v2416_v54, %v698_v16 }
 0x25d   : > { %v470_v22 = vpop.permute.xlu0 %469 }
 0x25e   : > { %v2576_v11 = vadd.f32 %v2449_v31, %v470_v22  ;;  %v904_v31 = vadd.f32 %v2418_v15, %v698_v16 }
 0x261   : > { %v480_v2 = vpop.permute.xlu0 %479 }
 0x262   : > { %v2604_v54 = vadd.f32 %v2464_v40, %v480_v2 }
 0x26e   : > { %v1016_v21 = vpop.xlane.xlu1 %1015 }
 0x26f   : > { %1976 = vrcp.f32 %v1016_v21  ;;  %v2601_v21 = vadd.f32 %v2462_v39, %v480_v2 }
 0x272   : > { %v688_v45 = vpop.permute.xlu1 %687 }
 0x276   : > { %v693_v50 = vpop.permute.xlu1 %692 }
 0x277   : > { %v898_v39 = vadd.f32 %v2414_v14, %v693_v50 }
 0x279   : > { %v1977_v51 = vpop.eup %1976 }
 0x27a   : > { %v2549_v49 = vpop.permute.xlu1 %702  ;;  %v1040_v55 = vmul.f32 %v1977_v51, %v2447_v29  ;;  %v1039_v25 = vmul.f32 %v1977_v51, %v2440_v26  ;;  %v2561_v29 = vadd.f32 %v2436_v23, %v460_v52  ;;  %v886_v26 = vadd.f32 %v2398_v4, %v683_v43 }
 0x27b   : > { %v2579_v23 = vadd.f32 %v2451_v32, %v470_v22  ;;  %v2593_v32 = vadd.f32 %v2429_v19, %v2547_v35  ;;  %v896_v22 = vadd.f32 %v2409_v12, %v693_v50 }
 0x27c   : > { %v1874_v30 = vpack.c.bf16 %v1043_v58, %v1040_v55  ;;  %v1876_v61 = vpack.c.bf16 %v1042_v33, %v1039_v25  ;;  %v890_v55 = vadd.f32 %v2400_v5, %v688_v45 }
 0x27e   : > { %v2555_v62 = vpop.permute.xlu1 %712  ;;  %1875 = vmatprep.subr.bf16.mxu0 %v1874_v30  ;;  %v908_v30 = vadd.f32 %v2420_v56, %v2549_v49 }
 0x27f   : > { %1877 = vmatpush1.bf16.xpose.msra.mxu0 %v1876_v61 }
 0x282   : > { %v465_v6 = vpop.permute.xlu1 %464 }
 0x283   : > { %v2564_v60 = vadd.f32 %v2438_v24, %v465_v6  ;;  %v2567_v59 = vadd.f32 %v2445_v28, %v465_v6  ;;  %v490_v28 = vpop.permute.xlu0 %489 }
 0x284   : > { %v2607_v15 = vadd.f32 %v2473_v47, %v490_v28  ;;  %v2610_v19 = vadd.f32 %v2475_v48, %v490_v28 }
 0x285   : > { %v1044_v1 = vmax.f32 %v2558_v63, %v2564_v60  ;;  %v1051_v10 = vmax.f32 %v2561_v29, %v2567_v59 }
 0x286   : > { %v475_v24 = vpop.permute.xlu1 %474  ;;  %1293 = vmatmul.mubr.f32.vlgmr.msra.gmra.mrb[16].mxu0 %v878_v53  ;;  %v892_v53 = vadd.f32 %v2403_v7, %v688_v45 }
 0x287   : > { %v1045_v41 = vrot.slane %v1044_v1, 4  ;;  %v1052_v13 = vrot.slane %v1051_v10, 4  ;;  %v2582_v4 = vadd.f32 %v2453_v34, %v475_v24  ;;  %v2585_v44 = vadd.f32 %v2460_v37, %v475_v24  ;;  %1297 = vmatprep.mubr.f32.mxu0 %v886_v26 }
 0x289   : > { %v1046_v38 = vmax.f32 %v1044_v1, %v1045_v41  ;;  %v1053_v43 = vmax.f32 %v1051_v10, %v1052_v13  ;;  %v1090_v34 = vmax.f32 %v2576_v11, %v2582_v4  ;;  %v1097_v37 = vmax.f32 %v2579_v23, %v2585_v44 }
 0x28a   : > { %v485_v7 = vpop.permute.xlu1 %484  ;;  %1298 = vmatmul.mubr.f32.gmra.mrb[18].mxu0 %v884_v20 }
 0x28b   : > { %v1047_v16 = vrot.slane %v1046_v38, 2  ;;  %v1054_v52 = vrot.slane %v1053_v43, 2  ;;  %v1091_v57 = vrot.slane %v1090_v34, 4  ;;  %v1098_v51 = vrot.slane %v1097_v37, 4  ;;  %1302 = vmatprep.mubr.f32.mxu0 %v892_v53 }
 0x28c   : > { %v2615_v40 = vadd.f32 %v2466_v42, %v485_v7  ;;  %v2618_v47 = vadd.f32 %v2471_v46, %v485_v7 }
 0x28d   : > { %v1048_v58 = vmax.f32 %v1046_v38, %v1047_v16  ;;  %v1055_v48 = vmax.f32 %v1053_v43, %v1054_v52  ;;  %v1092_v25 = vmax.f32 %v1090_v34, %v1091_v57  ;;  %v1099_v33 = vmax.f32 %v1097_v37, %v1098_v51 }
 0x28e   : > { %v1136_v5 = vmax.f32 %v2601_v21, %v2615_v40  ;;  %v1143_v14 = vmax.f32 %v2604_v54, %v2618_v47  ;;  %v495_v42 = vpop.permute.xlu1 %494  ;;  %1303 = vmatmul.mubr.f32.gmra.mrb[20].mxu0 %v890_v55  ;;  %v910_v16 = vadd.f32 %v2425_v17, %v2549_v49 }
 0x28f   : > { %v1049_v45 = vrot.slane %v1048_v58, 1  ;;  %v1056_v46 = vrot.slane %v1055_v48, 1  ;;  %v1093_v61 = vrot.slane %v1092_v25, 2  ;;  %v1100_v2 = vrot.slane %v1099_v33, 2  ;;  %1307 = vmatprep.mubr.f32.mxu0 %v898_v39 }
 0x290   : > { %v1137_v6 = vrot.slane %v1136_v5, 4  ;;  %v1144_v26 = vrot.slane %v1143_v14, 4  ;;  %v2628_v12 = vadd.f32 %v2520_v27, %v495_v42  ;;  %v2631_v56 = vadd.f32 %v2525_v36, %v495_v42 }
 0x291   : > { %v1050_v50 = vmax.f32 %v1048_v58, %v1049_v45  ;;  %v1057_v1 = vmax.f32 %v1055_v48, %v1056_v46  ;;  %v1094_v10 = vmax.f32 %v1092_v25, %v1093_v61  ;;  %v1101_v20 = vmax.f32 %v1099_v33, %v1100_v2 }
 0x292   : > { %v1138_v24 = vmax.f32 %v1136_v5, %v1137_v6  ;;  %v1145_v28 = vmax.f32 %v1143_v14, %v1144_v26  ;;  %v1182_v41 = vmax.f32 %v2607_v15, %v2628_v12  ;;  %v1189_v13 = vmax.f32 %v2610_v19, %v2631_v56  ;;  %1308 = vmatmul.mubr.f32.gmra.mrb[22].mxu0 %v896_v22 }
 0x293   : > { %v1058_v53 = vsub.f32 %v2558_v63, %v1050_v50  ;;  %v1059_v27 = vsub.f32 %v2561_v29, %v1057_v1  ;;  %v1060_v36 = vsub.f32 %v2564_v60, %v1050_v50  ;;  %v1061_v38 = vsub.f32 %v2567_v59, %v1057_v1  ;;  %1312 = vmatprep.mubr.f32.mxu0 %v904_v31 }
 0x294   : > { %v1095_v43 = vrot.slane %v1094_v10, 1  ;;  %v1102_v34 = vrot.slane %v1101_v20, 1  ;;  %v1139_v37 = vrot.slane %v1138_v24, 2  ;;  %v1146_v7 = vrot.slane %v1145_v28, 2 }
 0x295   : > { %v1062_v52 = vmul.f32 1.442695, %v1058_v53  ;;  %v1064_v57 = vmul.f32 1.442695, %v1059_v27  ;;  %v1066_v51 = vmul.f32 1.442695, %v1060_v36 }
 0x296   : > { %v1068_v55 = vmul.f32 1.442695, %v1061_v38  ;;  %v1096_v39 = vmax.f32 %v1094_v10, %v1095_v43  ;;  %v1103_v63 = vmax.f32 %v1101_v20, %v1102_v34  ;;  %v1140_v58 = vmax.f32 %v1138_v24, %v1139_v37  ;;  %1313 = vmatmul.mubr.f32.gmra.mrb[24].mxu0 %v2588_v3 }
 0x297   : > { %1978 = vpow2.f32 %v1062_v52  ;;  %v1147_v29 = vmax.f32 %v1145_v28, %v1146_v7  ;;  %v1183_v60 = vrot.slane %v1182_v41, 4  ;;  %v1190_v59 = vrot.slane %v1189_v13, 4  ;;  %1317 = vmatprep.mubr.f32.mxu0 %v910_v16 }
 0x298   : > { %1980 = vpow2.f32 %v1064_v57  ;;  %v1104_v31 = vsub.f32 %v2576_v11, %v1096_v39  ;;  %v1105_v48 = vsub.f32 %v2579_v23, %v1103_v63  ;;  %v1106_v17 = vsub.f32 %v2582_v4, %v1096_v39 }
 0x299   : > { %1982 = vpow2.f32 %v1066_v51  ;;  %v1107_v49 = vsub.f32 %v2585_v44, %v1103_v63  ;;  %v1141_v25 = vrot.slane %v1140_v58, 1  ;;  %v1148_v33 = vrot.slane %v1147_v29, 1 }
 0x29a   : > { %1984 = vpow2.f32 %v1068_v55  ;;  %v1108_v22 = vmul.f32 1.442695, %v1104_v31  ;;  %v1110_v3 = vmul.f32 1.442695, %v1105_v48  ;;  %v1112_v5 = vmul.f32 1.442695, %v1106_v17  ;;  %1318 = vmatmul.mubr.f32.gmra.mrb[26].mxu0 %v908_v30 }
 0x29b   : > { %v1114_v14 = vmul.f32 1.442695, %v1107_v49  ;;  %v1142_v42 = vmax.f32 %v1140_v58, %v1141_v25  ;;  %v1149_v45 = vmax.f32 %v1147_v29, %v1148_v33  ;;  %v1184_v46 = vmax.f32 %v1182_v41, %v1183_v60  ;;  %1322 = vmatprep.mubr.f32.mxu0 %v2593_v32 }
 0x29c   : > { %v914_v11 = vadd.f32 %v2427_v18, %v2547_v35  ;;  %v922_v23 = vadd.f32 %v2503_v9, %v2555_v62  ;;  %1986 = vpow2.f32 %v1108_v22  ;;  %v1191_v4 = vmax.f32 %v1189_v13, %v1190_v59 }
 0x29d   : > { %1988 = vpow2.f32 %v1110_v3  ;;  %v1150_v44 = vsub.f32 %v2601_v21, %v1142_v42  ;;  %v1151_v61 = vsub.f32 %v2604_v54, %v1149_v45  ;;  %v1152_v30 = vsub.f32 %v2615_v40, %v1142_v42 }
 0x29e   : > { %1990 = vpow2.f32 %v1112_v5  ;;  %v1153_v2 = vsub.f32 %v2618_v47, %v1149_v45  ;;  %v1185_v6 = vrot.slane %v1184_v46, 2  ;;  %v1192_v32 = vrot.slane %v1191_v4, 2  ;;  %1323 = vmatmul.mubr.f32.gmra.mrb[28].mxu0 %v914_v11 }
 0x29f   : > { %1992 = vpow2.f32 %v1114_v14  ;;  %v1154_v18 = vmul.f32 1.442695, %v1150_v44  ;;  %v1156_v35 = vmul.f32 1.442695, %v1151_v61  ;;  %v1158_v26 = vmul.f32 1.442695, %v1152_v30  ;;  %1327 = vmatprep.mubr.f32.mxu0 %v922_v23 }
 0x2a0   : > { %v920_v9 = vadd.f32 %v2501_v8, %v2555_v62  ;;  %v1160_v50 = vmul.f32 1.442695, %v1153_v2  ;;  %v1186_v21 = vmax.f32 %v1184_v46, %v1185_v6  ;;  %v1193_v1 = vmax.f32 %v1191_v4, %v1192_v32 }
 0x2a1   : > { %v2659_v54 = vpop.eup %1978  ;;  %1994 = vpow2.f32 %v1154_v18 }
 0x2a2   : > { %v2661_v40 = vpop.eup %1980  ;;  %1996 = vpow2.f32 %v1156_v35  ;;  %v1187_v47 = vrot.slane %v1186_v21, 1  ;;  %v1194_v10 = vrot.slane %v1193_v1, 1  ;;  %1328 = vmatmul.mubr.f32.gmra.mrb[30].mxu0 %v920_v9 }
 0x2a3   : > { %v2663_v20 = vpop.eup %1982  ;;  %1998 = vpow2.f32 %v1158_v26 }
 0x2a4   : > { %v2665_v24 = vpop.eup %1984  ;;  %v1070_v8 = vadd.f32 %v2663_v20, %v2659_v54  ;;  %2000 = vpow2.f32 %v1160_v50  ;;  %v1188_v62 = vmax.f32 %v1186_v21, %v1187_v47  ;;  %v1195_v28 = vmax.f32 %v1193_v1, %v1194_v10 }
 0x2a5   : > { %v1077_v41 = vadd.f32 %v2665_v24, %v2661_v40 }
 0x2a6   : > { %v2671_v13 = vpop.eup %1986  ;;  %v1071_v53 = vrot.slane %v1070_v8, 4  ;;  %v1196_v27 = vsub.f32 %v2607_v15, %v1188_v62  ;;  %v1198_v36 = vsub.f32 %v2628_v12, %v1188_v62  ;;  %v1197_v38 = vsub.f32 %v2610_v19, %v1195_v28 }
 0x2a7   : > { %v2676_v43 = vpop.eup %1988  ;;  %v1078_v34 = vrot.slane %v1077_v41, 4  ;;  %v1199_v37 = vsub.f32 %v2631_v56, %v1195_v28 }
 0x2a8   : > { %v2679_v7 = vpop.eup %1990  ;;  %v1072_v16 = vadd.f32 %v1071_v53, %v1070_v8  ;;  %v1200_v52 = vmul.f32 1.442695, %v1196_v27  ;;  %v1204_v57 = vmul.f32 1.442695, %v1198_v36  ;;  %v1202_v51 = vmul.f32 1.442695, %v1197_v38 }
 0x2a9   : > { %v2681_v55 = vpop.eup %1992  ;;  %v1079_v39 = vadd.f32 %v1078_v34, %v1077_v41  ;;  %v1116_v15 = vadd.f32 %v2679_v7, %v2671_v13  ;;  %v1206_v12 = vmul.f32 1.442695, %v1199_v37 }
 0x2aa   : > { %v1073_v63 = vrot.slane %v1072_v16, 2  ;;  %v1123_v19 = vadd.f32 %v2681_v55, %v2676_v43  ;;  %2002 = vpow2.f32 %v1200_v52 }
 0x2ab   : > { %v2687_v58 = vpop.eup %1994  ;;  %v1080_v56 = vrot.slane %v1079_v39, 2  ;;  %v1117_v29 = vrot.slane %v1116_v15, 4  ;;  %2004 = vpow2.f32 %v1204_v57 }
 0x2ac   : > { %v2689_v60 = vpop.eup %1996  ;;  %v1074_v59 = vadd.f32 %v1073_v63, %v1072_v16  ;;  %v1124_v31 = vrot.slane %v1123_v19, 4  ;;  %2006 = vpow2.f32 %v1202_v51 }
 0x2ad   : > { %v2691_v48 = vpop.eup %1998  ;;  %v1118_v17 = vadd.f32 %v1117_v29, %v1116_v15  ;;  %2008 = vpow2.f32 %v1206_v12  ;;  %v1081_v49 = vadd.f32 %v1080_v56, %v1079_v39 }
 0x2ae   : > { %v2693_v25 = vpop.eup %2000  ;;  %v1075_v33 = vrot.slane %v1074_v59, 1  ;;  %v1125_v22 = vadd.f32 %v1124_v31, %v1123_v19  ;;  %v1162_v3 = vadd.f32 %v2691_v48, %v2687_v58 }
 0x2af   : > { %v1119_v5 = vrot.slane %v1118_v17, 2  ;;  %v1169_v14 = vadd.f32 %v2693_v25, %v2689_v60  ;;  %v1082_v42 = vrot.slane %v1081_v49, 1 }
 0x2b0   : > { %v1126_v45 = vrot.slane %v1125_v22, 2  ;;  %v1163_v46 = vrot.slane %v1162_v3, 4  ;;  %v1076_v11 = vadd.f32 %v1075_v33, %v1074_v59 }
 0x2b1   : > { %v1120_v23 = vadd.f32 %v1119_v5, %v1118_v17  ;;  %v1170_v4 = vrot.slane %v1169_v14, 4  ;;  %v1083_v44 = vadd.f32 %v1082_v42, %v1081_v49 }
 0x2b2   : > { %v1164_v61 = vadd.f32 %v1163_v46, %v1162_v3  ;;  %2010 = vrcp.f32 %v1076_v11  ;;  %v1127_v30 = vadd.f32 %v1126_v45, %v1125_v22 }
 0x2b3   : > { %v1121_v2 = vrot.slane %v1120_v23, 1  ;;  %v1171_v6 = vadd.f32 %v1170_v4, %v1169_v14  ;;  %2012 = vrcp.f32 %v1083_v44 }
 0x2b4   : > { %v2699_v32 = vpop.eup %2002  ;;  %v1165_v18 = vrot.slane %v1164_v61, 2  ;;  %v1128_v35 = vrot.slane %v1127_v30, 1 }
 0x2b5   : > { %v2701_v26 = vpop.eup %2004  ;;  %v1172_v9 = vrot.slane %v1171_v6, 2  ;;  %v1122_v50 = vadd.f32 %v1121_v2, %v1120_v23  ;;  %v401_v2 = vld [vmem:[%s2857_s6] sm:$0xff] }
 0x2b6   : > { %v2703_v21 = vpop.eup %2006  ;;  %v1166_v1 = vadd.f32 %v1165_v18, %v1164_v61  ;;  %v1208_v47 = vadd.f32 %v2701_v26, %v2699_v32  ;;  %v1129_v10 = vadd.f32 %v1128_v35, %v1127_v30  ;;  %1818 = vmatprep.mubr.msk.f32.mxu0 %vm497_vm0, %v401_v2  ;;  %v417_v18 = vld [vmem:[%s2859_s8] sm:$0xff]  ;;  %v418_v35 = vld [vmem:[%s2859_s8 + $0x8] sm:$0xff] }
 0x2b7   : > { %v2009_v8 = vpop.eup %2008  ;;  %2014 = vrcp.f32 %v1122_v50  ;;  %v1173_v62 = vadd.f32 %v1172_v9, %v1171_v6 }
 0x2b8   : > { %v1167_v28 = vrot.slane %v1166_v1, 1  ;;  %v1209_v41 = vrot.slane %v1208_v47, 4  ;;  %v1215_v53 = vadd.f32 %v2009_v8, %v2703_v21  ;;  %2016 = vrcp.f32 %v1129_v10 }
 0x2b9   : > { %v1174_v27 = vrot.slane %v1173_v62, 1 }
 0x2ba   : > { %v1210_v36 = vadd.f32 %v1209_v41, %v1208_v47  ;;  %v1216_v38 = vrot.slane %v1215_v53, 4  ;;  %v1168_v34 = vadd.f32 %v1167_v28, %v1166_v1 }
 0x2bb   : > { %v1175_v37 = vadd.f32 %v1174_v27, %v1173_v62  ;;  %v420_v62 = vld [vmem:[%s2859_s8 + $0x18] sm:$0xff] }
 0x2bc   : > { %v2011_v16 = vpop.eup %2010  ;;  %v1211_v52 = vrot.slane %v1210_v36, 2  ;;  %v1217_v57 = vadd.f32 %v1216_v38, %v1215_v53  ;;  %2018 = vrcp.f32 %v1168_v34 }
 0x2bd   : > { %v2013_v51 = vpop.eup %2012  ;;  %v1085_v39 = vmul.f32 %v2011_v16, %v2659_v54  ;;  %v1088_v15 = vmul.f32 %v2011_v16, %v2663_v20  ;;  %2020 = vrcp.f32 %v1175_v37  ;;  %v421_v37 = vld [vmem:[%s2859_s8 + $0x20] sm:$0xff]  ;;  %v422_v16 = vld [vmem:[%s2859_s8 + $0x28] sm:$0xff] }
 0x2be   : > { %v1212_v12 = vadd.f32 %v1211_v52, %v1210_v36  ;;  %v1218_v63 = vrot.slane %v1217_v57, 2  ;;  %v1087_v19 = vmul.f32 %v2013_v51, %v2661_v40  ;;  %v1089_v56 = vmul.f32 %v2013_v51, %v2665_v24 }
 0x2bf   : > { %v2712_v29 = vpack.c.bf16 %v1088_v15, %v1085_v39 }
 0x2c0   : > { %v1213_v59 = vrot.slane %v1212_v12, 1  ;;  %v1219_v31 = vadd.f32 %v1218_v63, %v1217_v57  ;;  %v2714_v17 = vpack.c.bf16 %v1089_v56, %v1087_v19  ;;  %v423_v19 = vld [vmem:[%s2859_s8 + $0x30] sm:$0xff]  ;;  %v424_v56 = vld [vmem:[%s2859_s8 + $0x38] sm:$0xff] }
 0x2c1   : > { %v2015_v49 = vpop.eup %2014 }
 0x2c2   : > { %v2017_v33 = vpop.eup %2016  ;;  %1910 = vmatprep.subr.bf16.mxu1 %v2714_v17  ;;  %v1131_v54 = vmul.f32 %v2015_v49, %v2671_v13  ;;  %v1134_v20 = vmul.f32 %v2015_v49, %v2679_v7  ;;  %v1220_v22 = vrot.slane %v1219_v31, 1  ;;  %v1214_v3 = vadd.f32 %v1213_v59, %v1212_v12 }
 0x2c3   : > { %1914 = vmatpush1.bf16.msra.mxu1 %v2712_v29  ;;  %v1133_v40 = vmul.f32 %v2017_v33, %v2676_v43  ;;  %v1135_v24 = vmul.f32 %v2017_v33, %v2681_v55 }
 0x2c4   : > { %v2722_v5 = vpack.c.bf16 %v1134_v20, %v1131_v54  ;;  %v1221_v14 = vadd.f32 %v1220_v22, %v1219_v31  ;;  %2022 = vrcp.f32 %v1214_v3  ;;  %v402_v20 = vld [vmem:[%s2857_s6 + $0x8] sm:$0xff]  ;;  %v403_v22 = vld [vmem:[%s2857_s6 + $0x10] sm:$0xff]  ;;  %v404_v3 = vld [vmem:[%s2857_s6 + $0x18] sm:$0xff] }
 0x2c5   : > { %v2724_v42 = vpack.c.bf16 %v1135_v24, %v1133_v40  ;;  %v407_v40 = vld [vmem:[%s2857_s6 + $0x30] sm:$0xff]  ;;  %v408_v24 = vld [vmem:[%s2857_s6 + $0x38] sm:$0xff] }
 0x2c6   : > { %v2019_v45 = vpop.eup %2018  ;;  %2024 = vrcp.f32 %v1221_v14 }
 0x2c7   : > { %v2021_v46 = vpop.eup %2020  ;;  %1911 = vmatprep.subr.bf16.mxu1 %v2724_v42  ;;  %v1177_v13 = vmul.f32 %v2019_v45, %v2687_v58  ;;  %v1180_v7 = vmul.f32 %v2019_v45, %v2691_v48 }
 0x2c8   : > { %1915 = vmatpush1.bf16.msra.mxu1 %v2722_v5  ;;  %v1179_v43 = vmul.f32 %v2021_v46, %v2689_v60  ;;  %v1181_v55 = vmul.f32 %v2021_v46, %v2693_v25 }
 0x2c9   : > { %v2732_v11 = vpack.c.bf16 %v1180_v7, %v1177_v13 }
 0x2ca   : > { %v2734_v23 = vpack.c.bf16 %v1181_v55, %v1179_v43  ;;  %v1473_v55 = vpop.permute.xlu0 %1472 }
 0x2cc   : > { %1912 = vmatprep.subr.bf16.mxu1 %v2734_v23 }
 0x2cd   : > { %1916 = vmatpush1.bf16.msra.mxu1 %v2732_v11 }
 0x2ce   : > { %v2023_v4 = vpop.eup %2022 }
 0x2cf   : > { %v1223_v44 = vmul.f32 %v2023_v4, %v2699_v32  ;;  %v1226_v58 = vmul.f32 %v2023_v4, %v2701_v26 }
 0x2d0   : > { %v2025_v48 = vpop.eup %2024 }
 0x2d1   : > { %v1225_v61 = vmul.f32 %v2025_v48, %v2703_v21  ;;  %v1227_v30 = vmul.f32 %v2025_v48, %v2009_v8  ;;  %v2741_v60 = vpack.c.bf16 %v1226_v58, %v1223_v44  ;;  %v419_v8 = vld [vmem:[%s2859_s8 + $0x10] sm:$0xff]  ;;  %v1478_v44 = vpop.permute.xlu1 %1477 }
 0x2d3   : > { %v2743_v25 = vpack.c.bf16 %v1227_v30, %v1225_v61 }
 0x2d5   : > { %1913 = vmatprep.subr.bf16.mxu1 %v2743_v25 }
 0x2d6   : > { %1917 = vmatpush1.bf16.msra.mxu1 %v2741_v60 }
 0x359   : > { %v1294_v6 = vpop.f32.mrb[16].mxu0 }
 0x35a   : > { %v1296_v32 = vpop.f32.mrb[17].mxu0  ;;  %v1333_v9 = vmul.f32 %v1294_v6, %v417_v18  ;;  %v1488_v18 = vpop.permute.xlu1 %1487 }
 0x35d   : > { %v1299_v26 = vpop.f32.mrb[18].mxu0 }
 0x35e   : > { %v1334_v50 = vmul.f32 %v1299_v26, %v418_v35  ;;  %v1301_v21 = vpop.f32.mrb[19].mxu0 }
 0x360   : > { %v1878_v1 = vpack.c.bf16 %v1334_v50, %v1333_v9 }
 0x361   : > { %v1304_v47 = vpop.f32.mrb[20].mxu0 }
 0x362   : > { %v1306_v10 = vpop.f32.mrb[21].mxu0  ;;  %1879 = vmatprep.subr.bf16.mxu0 %v1878_v1  ;;  %v1335_v41 = vmul.f32 %v1304_v47, %v419_v8 }
 0x363   : > { %1881 = vmatpush3.bf16.msra.mxu0 %v1878_v1 }
 0x365   : > { %v1309_v28 = vpop.f32.mrb[22].mxu0 }
 0x366   : > { %v1336_v53 = vmul.f32 %v1309_v28, %v420_v62  ;;  %v1311_v27 = vpop.f32.mrb[23].mxu0  ;;  %v1498_v62 = vpop.permute.xlu1 %1497 }
 0x368   : > { %v1882_v36 = vpack.c.bf16 %v1336_v53, %v1335_v41 }
 0x369   : > { %v1314_v38 = vpop.f32.mrb[24].mxu0 }
 0x36a   : > { %v1316_v34 = vpop.f32.mrb[25].mxu0  ;;  %1883 = vmatprep.subr.bf16.mxu0 %v1882_v36  ;;  %v1337_v57 = vmul.f32 %v1314_v38, %v421_v37 }
 0x36b   : > { %1885 = vmatpush3.bf16.msra.mxu0 %v1882_v36 }
 0x36d   : > { %v1319_v52 = vpop.f32.mrb[26].mxu0 }
 0x36e   : > { %v1338_v51 = vmul.f32 %v1319_v52, %v422_v16  ;;  %v1321_v39 = vpop.f32.mrb[27].mxu0  ;;  %v1508_v52 = vpop.permute.xlu1 %1507 }
 0x370   : > { %v1886_v15 = vpack.c.bf16 %v1338_v51, %v1337_v57 }
 0x371   : > { %v1324_v12 = vpop.f32.mrb[28].mxu0 }
 0x372   : > { %v1326_v63 = vpop.f32.mrb[29].mxu0  ;;  %1887 = vmatprep.subr.bf16.mxu0 %v1886_v15  ;;  %v1339_v31 = vmul.f32 %v1324_v12, %v423_v19 }
 0x373   : > { %1889 = vmatpush3.bf16.msra.mxu0 %v1886_v15 }
 0x375   : > { %v1329_v59 = vpop.f32.mrb[30].mxu0 }
 0x376   : > { %v1340_v49 = vmul.f32 %v1329_v59, %v424_v56  ;;  %v1331_v33 = vpop.f32.mrb[31].mxu0 }
 0x378   : > { %v1890_v54 = vpack.c.bf16 %v1340_v49, %v1339_v31 }
 0x37a   : > { %1891 = vmatprep.subr.bf16.mxu0 %v1890_v54 }
 0x37b   : > { %1893 = vmatpush3.bf16.msra.mxu0 %v1890_v54 }
 0x37c   : > { %1895 = vmatprep.subr.bf16.mxu0 %v2714_v17  ;;  %v405_v17 = vld [vmem:[%s2857_s6 + $0x20] sm:$0xff] }
 0x37e   : > { %1819 = vmatmul.mubr.msk.f32.vlgmr.msra.gmra.mrb[32].mxu0 %vm497_vm0, %v402_v20 }
 0x37f   : > { %1897 = vmatpush1.bf16.msra.mxu0 %v2712_v29  ;;  %1821 = vmatprep.mubr.msk.f32.mxu0 %vm497_vm0, %v403_v22  ;;  %v406_v29 = vld [vmem:[%s2857_s6 + $0x28] sm:$0xff] }
 0x380   : > { %1899 = vmatprep.subr.bf16.mxu0 %v2724_v42 }
 0x382   : > { %1822 = vmatmul.mubr.msk.f32.gmra.mrb[34].mxu0 %vm497_vm0, %v404_v3 }
 0x383   : > { %1901 = vmatpush1.bf16.msra.mxu0 %v2722_v5  ;;  %1824 = vmatprep.mubr.msk.f32.mxu0 %vm497_vm0, %v405_v17 }
 0x384   : > { %1903 = vmatprep.subr.bf16.mxu0 %v2734_v23 }
 0x386   : > { %1825 = vmatmul.mubr.msk.f32.gmra.mrb[36].mxu0 %vm497_vm0, %v406_v29 }
 0x387   : > { %1905 = vmatpush1.bf16.msra.mxu0 %v2732_v11  ;;  %1827 = vmatprep.mubr.msk.f32.mxu0 %vm497_vm0, %v407_v40 }
 0x388   : > { %1907 = vmatprep.subr.bf16.mxu0 %v2743_v25 }
 0x38a   : > { %1828 = vmatmul.mubr.msk.f32.gmra.mrb[38].mxu0 %vm497_vm0, %v408_v24 }
 0x38b   : > { %1909 = vmatpush1.bf16.msra.mxu0 %v2741_v60  ;;  %1598 = vmatprep.mubr.f32.mxu0 %v2034_v0 }
 0x451   : > { %v1820_v5 = vpop.f32.mrb[32].mxu0 }
 0x452   : > { %v1431_v14 = vpop.f32.mrb[33].mxu0 }
 0x453   : > { %1773 = vmatmul.mubr.msk.f32.vlgmr.msra.gmra.mrb[40].mxu0 %vm497_vm0, %v1431_v14 }
 0x454   : > { %1604 = vmatprep.mubr.f32.mxu0 %v2034_v0 }
 0x455   : > { %v1823_v42 = vpop.f32.mrb[34].mxu0 }
 0x456   : > { %v1441_v45 = vpop.f32.mrb[35].mxu0 }
 0x457   : > { %1774 = vmatmul.mubr.msk.f32.gmra.mrb[42].mxu0 %vm497_vm0, %v1820_v5  ;;  %1775 = vmatmul.mubr.msk.f32.vlgmr.msra.gmra.mrb[32].mxu1 %vm497_vm0, %v1441_v45 }
 0x458   : > { %1616 = vmatprep.mubr.f32.mxu1 %v2034_v0 }
 0x459   : > { %v1826_v46 = vpop.f32.mrb[36].mxu0 }
 0x45a   : > { %v1451_v13 = vpop.f32.mrb[37].mxu0 }
 0x45b   : > { %1776 = vmatmul.mubr.msk.f32.gmra.mrb[34].mxu1 %vm497_vm0, %v1823_v42 }
 0x45c   : > { %1622 = vmatprep.mubr.f32.mxu1 %v2034_v0 }
 0x45d   : > { %v1829_v7 = vpop.f32.mrb[38].mxu0 }
 0x45e   : > { %v1461_v43 = vpop.f32.mrb[39].mxu0 }
 0x45f   : > { %1777 = vmatmul.mubr.msk.f32.gmra.mrb[36].mxu1 %vm497_vm0, %v1451_v13 }
 0x460   : > { %1628 = vmatprep.mubr.f32.mxu1 %v2034_v0 }
 0x463   : > { %1778 = vmatmul.mubr.msk.f32.gmra.mrb[38].mxu1 %vm497_vm0, %v1826_v46 }
 0x464   : > { %1634 = vmatprep.mubr.f32.mxu1 %v2034_v0 }
 0x467   : > { %1779 = vmatmul.mubr.msk.f32.gmra.mrb[40].mxu1 %vm497_vm0, %v1461_v43 }
 0x468   : > { %1640 = vmatprep.mubr.f32.mxu1 %v2034_v0  ;;  %v1483_v0 = vpop.permute.xlu0 %1482 }
 0x46b   : > { %1780 = vmatmul.mubr.msk.f32.gmra.mrb[42].mxu1 %vm497_vm0, %v1829_v7 }
 0x46c   : > { %v1493_v21 = vpop.permute.xlu0 %1492 }
 0x470   : > { %v1503_v36 = vpop.permute.xlu0 %1502 }
 0x526   : > { %v1600_v11 = vpop.f32.mrb[40].mxu0 }
 0x527   : > { %v1601_v23 = vadd.f32 %v1600_v11, %v1473_v55  ;;  %v1602_v4 = vpop.f32.mrb[41].mxu0 }
 0x528   : > { %v1603_v58 = vadd.f32 %v1602_v4, %v1473_v55 }
 0x529   : > { %1647 = vst [vmem:[%s2830_s11] sm:$0xff] %v1601_v23 }
 0x52a   : > { %1648 = vst [vmem:[%s2830_s11 + $0x8] sm:$0xff] %v1603_v58  ;;  %v1606_v48 = vpop.f32.mrb[42].mxu0  ;;  %v1612_v61 = vpop.f32.mrb[32].mxu1 }
 0x52b   : > { %v1607_v30 = vadd.f32 %v1606_v48, %v1478_v44  ;;  %v1613_v60 = vadd.f32 %v1612_v61, %v1483_v0  ;;  %v1608_v25 = vpop.f32.mrb[43].mxu0  ;;  %v1614_v2 = vpop.f32.mrb[33].mxu1 }
 0x52c   : > { %v1609_v6 = vadd.f32 %v1608_v25, %v1478_v44  ;;  %v1615_v32 = vadd.f32 %v1614_v2, %v1483_v0 }
 0x52d   : > { %1649 = vst [vmem:[%s2830_s11 + $0x10] sm:$0xff] %v1607_v30  ;;  %1651 = vst [vmem:[%s2830_s11 + $0x20] sm:$0xff] %v1613_v60 }
 0x52e   : > { %1650 = vst [vmem:[%s2830_s11 + $0x18] sm:$0xff] %v1609_v6  ;;  %1652 = vst [vmem:[%s2830_s11 + $0x28] sm:$0xff] %v1615_v32  ;;  %v1618_v35 = vpop.f32.mrb[34].mxu1 }
 0x52f   : > { %v1619_v26 = vadd.f32 %v1618_v35, %v1488_v18  ;;  %v1620_v9 = vpop.f32.mrb[35].mxu1 }
 0x530   : > { %v1621_v50 = vadd.f32 %v1620_v9, %v1488_v18 }
 0x531   : > { %1653 = vst [vmem:[%s2830_s11 + $0x30] sm:$0xff] %v1619_v26 }
 0x532   : > { %1654 = vst [vmem:[%s2830_s11 + $0x38] sm:$0xff] %v1621_v50  ;;  %v1624_v1 = vpop.f32.mrb[36].mxu1 }
 0x533   : > { %v1625_v47 = vadd.f32 %v1624_v1, %v1493_v21  ;;  %v1626_v10 = vpop.f32.mrb[37].mxu1 }
 0x534   : > { %v1627_v8 = vadd.f32 %v1626_v10, %v1493_v21 }
 0x535   : > { %1655 = vst [vmem:[%s2830_s11 + $0x40] sm:$0xff] %v1625_v47 }
 0x536   : > { %1656 = vst [vmem:[%s2830_s11 + $0x48] sm:$0xff] %v1627_v8  ;;  %v1630_v28 = vpop.f32.mrb[38].mxu1 }
 0x537   : > { %v1631_v41 = vadd.f32 %v1630_v28, %v1498_v62  ;;  %v1632_v53 = vpop.f32.mrb[39].mxu1 }
 0x538   : > { %v1633_v27 = vadd.f32 %v1632_v53, %v1498_v62 }
 0x539   : > { %1657 = vst [vmem:[%s2830_s11 + $0x50] sm:$0xff] %v1631_v41 }
 0x53a   : > { %1658 = vst [vmem:[%s2830_s11 + $0x58] sm:$0xff] %v1633_v27  ;;  %v1636_v38 = vpop.f32.mrb[40].mxu1 }
 0x53b   : > { %v1637_v34 = vadd.f32 %v1636_v38, %v1503_v36  ;;  %v1638_v37 = vpop.f32.mrb[41].mxu1 }
 0x53c   : > { %v1639_v16 = vadd.f32 %v1638_v37, %v1503_v36 }
 0x53d   : > { %1659 = vst [vmem:[%s2830_s11 + $0x60] sm:$0xff] %v1637_v34 }
 0x53e   : > { %1660 = vst [vmem:[%s2830_s11 + $0x68] sm:$0xff] %v1639_v16  ;;  %v1642_v57 = vpop.f32.mrb[42].mxu1 }
 0x53f   : > { %v1643_v51 = vadd.f32 %v1642_v57, %v1508_v52  ;;  %v1644_v39 = vpop.f32.mrb[43].mxu1 }
 0x540   : > { %v1645_v15 = vadd.f32 %v1644_v39, %v1508_v52 }
 0x541   : > { %1661 = vst [vmem:[%s2830_s11 + $0x70] sm:$0xff] %v1643_v51 }
 0x542   : > { %1662 = vst [vmem:[%s2830_s11 + $0x78] sm:$0xff] %v1645_v15 }
 0x543 PF: > { %s19_s30 = sadd.s32 1, %s2032_s30  }
 0x544   : > { %p16_p4 = scmp.ge.s32.totalorder %s19_s30, 4  }
 0x546   :  { %18 = sbr.rel (!%p16_p4) target bundleno = 1 (0x1), region = 89 }

</bundles_post_ra>
